<compile_context>
chip_gen: v7x
topology: tpu7x:2x2x1
jax: 0.10.0
libtpu: 0.0.40
codegen_flags: <defaults>
</compile_context>

<pallas_src>
import functools

import jax
import jax.numpy as jnp
from jax.experimental import pallas as pl
from jax.experimental.pallas import tpu as pltpu

# --- Spectra hyper-parameters (module defaults, small synthetic shapes) ---
PATCH_SIZE = 8      # Spectra(patch_size=8) keeps dim = patch_size * num_features small
HEADS = 1           # module default
DIM_HEAD = 64       # module default
P_FACTOR = 2        # module default
EPS = 1e-5          # nn.LayerNorm / nn.GroupNorm default eps
NUM_MASKED = 4      # mask_and_add_cls_token(num_masked_patches=4)


def _layernorm(z):
    mu = jnp.mean(z, axis=-1, keepdims=True)
    var = jnp.mean((z - mu) ** 2, axis=-1, keepdims=True)
    return (z - mu) * jax.lax.rsqrt(var + EPS)


# ---------------------------------------------------------------- fused kernel
def _spectra_kernel(mask_ref,                       # SMEM (num_masked,) int32, scalar prefetch
                    patch_ref,                      # (SP, d) f32; row 0 = cls slot, rows>=valid_rows = pad
                    wA_ref,                         # (d, 896) bf16  [We | W1|W2 | Wul|Wur|pad | W3]
                    wB_ref,                         # (inner, 768) bf16 [Wq|Wk|Wv|Wo|Wi|Wf], 128-aligned groups
                    wC_ref,                         # (hid, d) bf16  mLSTM down projection
                    b_ref,                          # (1, 1792) f32  packed biases, same order
                    out_ref,                        # (SP, d) f32
                    *, valid_rows):
    f32 = jnp.float32
    bf16 = jnp.bfloat16
    SP, d = patch_ref.shape
    inner, WB = wB_ref.shape
    hid = wC_ref.shape[0]
    WA = wA_ref.shape[1]
    o12, oulr, ow3 = d, 3 * d, WA - d               # static, 128-aligned column offsets

    # ---- AudioEmbedder + mask_and_add_cls_token (cls_token and mask_token are zeros) ----
    pat = patch_ref[...]
    row_ids = jax.lax.broadcasted_iota(jnp.int32, (SP, 1), 0)
    keep = jnp.logical_and(row_ids > 0, row_ids < valid_rows).astype(f32)  # cls + pad rows -> 0
    for j in range(mask_ref.shape[0]):                                     # masked rows -> 0
        keep = keep * (row_ids != mask_ref[j]).astype(f32)
    tok = (jnp.dot(pat.astype(bf16), wA_ref[:, 0:d], preferred_element_type=f32)
           + b_ref[:, 0:d]) * keep                  # (SP, d) f32
    residual = tok

    # ---- LayerNorm + fused first/second path (one lane-dense (d, 2d) matmul) ----
    xn = _layernorm(tok)
    fs = (jnp.dot(xn.astype(bf16), wA_ref[:, o12:oulr], preferred_element_type=f32)
          + b_ref[:, o12:oulr])
    first, second = fs[:, :d], fs[:, d:]
    act2 = jax.nn.silu(second)

    # ---- mLSTM block (chunkwise-parallel, equal to the stabilized recurrent form) ----
    # TODO(synk): the mLSTM class is not defined in the provided audio_xlstm source; this
    # implements the xLSTM-paper mLSTM block (heads=1, exp gates) without causal-conv/skip.
    xm = _layernorm(first)
    ur = (jnp.dot(xm.astype(bf16), wA_ref[:, oulr:ow3], preferred_element_type=f32)
          + b_ref[:, oulr:ow3])
    xu, r = ur[:, :inner], ur[:, inner:inner + hid]

    # single fused q|k|v|o|i|f projection; every slice below starts on a 128-lane boundary
    slab = (jnp.dot(xu.astype(bf16), wB_ref[...], preferred_element_type=f32)
            + b_ref[:, WA:WA + WB])
    q = slab[:, 0:hid]
    k = slab[:, 128:128 + hid] * (1.0 / jnp.sqrt(jnp.float32(DIM_HEAD)))
    v = slab[:, 256:256 + hid]
    og = jax.nn.sigmoid(slab[:, 384:384 + hid])
    i_col = slab[:, 512:513]                        # (SP,1) input-gate pre-activation
    f_col = slab[:, 640:641]                        # (SP,1) forget-gate pre-activation

    # log-decay matrix D[t,s] = F_t - F_s + i_s (s <= t), F_t = cumsum(f)_t, built with two
    # tiny f32 matmuls against iota masks (no transposes, no serial loop).
    rows = jax.lax.broadcasted_iota(jnp.int32, (SP, SP), 0)
    cols = jax.lax.broadcasted_iota(jnp.int32, (SP, SP), 1)
    tri = rows >= cols
    tri_f = tri.astype(f32)
    G = (f_col * (rows > cols).astype(f32)          # G[r,s] = f_r for r>s
         + i_col * (rows == cols).astype(f32))      #        = i_r for r==s
    D = jnp.dot(tri_f, G, preferred_element_type=f32)        # (SP,SP)
    F = jnp.dot(tri_f, f_col, preferred_element_type=f32)    # (SP,1): F_t
    # stabilizer m_t = max(F_t + m_0, max_{s<=t} D[t,s]) with m_0 = 0
    m = jnp.maximum(jnp.max(jnp.where(tri, D, -1e30), axis=-1, keepdims=True), F)
    dec = jnp.where(tri, jnp.exp(D - m), 0.0)                 # stabilized decay weights

    scores = jax.lax.dot_general(q.astype(bf16), k.astype(bf16),
                                 (((1,), (1,)), ((), ())),
                                 preferred_element_type=f32) * dec          # (SP,SP) f32
    # exact stabilized normalizer: max(|rowsum|, exp(-m)) (not 1.0)
    den = jnp.maximum(jnp.abs(jnp.sum(scores, axis=-1, keepdims=True)), jnp.exp(-m))
    num = jnp.dot(scores.astype(bf16), v.astype(bf16), preferred_element_type=f32)
    h = og * num / den                               # (SP, hid)

    hn = _layernorm(h)                               # GroupNorm(num_groups=1) == per-row norm
    pred = (jnp.dot((hn * jax.nn.silu(r)).astype(bf16), wC_ref[...],
                    preferred_element_type=f32)
            + b_ref[:, WA + WB:WA + WB + d] + first)

    out = (jnp.dot((pred * act2).astype(bf16), wA_ref[:, ow3:WA],
                   preferred_element_type=f32)
           + b_ref[:, ow3:WA] + residual)
    out_ref[...] = out.astype(out_ref.dtype)


# ---------------------------------------------------------------- parameters (built ONCE)
def _torch_linear_init(key, fan_in, fan_out):
    """PyTorch nn.Linear default init: U(-1/sqrt(fan_in), 1/sqrt(fan_in)); W stored (in,out)."""
    kw, kb = jax.random.split(key)
    bound = 1.0 / jnp.sqrt(jnp.float32(fan_in))
    w = jax.random.uniform(kw, (fan_in, fan_out), jnp.float32, -bound, bound)
    b = jax.random.uniform(kb, (1, fan_out), jnp.float32, -bound, bound)
    return w, b


def init_spectra_params(key, d):
    """Deterministic fresh-module parameters, packed into lane-dense bf16 slabs (run once)."""
    inner = P_FACTOR * d
    hid = HEADS * DIM_HEAD
    keys = jax.random.split(key, 13)
    we, be = _torch_linear_init(keys[0], d, d)        # AudioEmbedder(d, d)
    w1, b1 = _torch_linear_init(keys[1], d, d)        # first_path
    w2, b2 = _torch_linear_init(keys[2], d, d)        # second_path
    w3, b3 = _torch_linear_init(keys[3], d, d)        # final Linear(d, d)
    wul, bul = _torch_linear_init(keys[4], d, inner)  # mLSTM up (left)
    wur, bur = _torch_linear_init(keys[5], d, hid)    # mLSTM up (right / gate)
    wq, bq = _torch_linear_init(keys[6], inner, hid)
    wk, bk = _torch_linear_init(keys[7], inner, hid)
    wv, bv = _torch_linear_init(keys[8], inner, hid)
    wi, bi = _torch_linear_init(keys[9], inner, HEADS)
    wf, bf = _torch_linear_init(keys[10], inner, HEADS)
    wo, bo = _torch_linear_init(keys[11], inner, hid)
    wd, bd = _torch_linear_init(keys[12], hid, d)

    def pad_to(a, width):
        return jnp.pad(a, ((0, 0), (0, width - a.shape[1])))

    # (d, 896) slab: We | W1 | W2 | Wul|Wur(pad->384) | W3   (all offsets multiples of 128)
    w_ulr = pad_to(jnp.concatenate([wul, wur], axis=1), inner + 128)
    b_ulr = pad_to(jnp.concatenate([bul, bur], axis=1), inner + 128)
    wA = jnp.concatenate([we, w1, w2, w_ulr, w3], axis=1)

    # (inner, 768) slab: q|k|v|o|i|f each padded to its own 128-lane group (free in bf16)
    wB = jnp.concatenate([pad_to(wq, 128), pad_to(wk, 128), pad_to(wv, 128),
                          pad_to(wo, 128), pad_to(wi, 128), pad_to(wf, 128)], axis=1)
    b_qkv = jnp.concatenate([pad_to(bq, 128), pad_to(bk, 128), pad_to(bv, 128),
                             pad_to(bo, 128), pad_to(bi, 128), pad_to(bf, 128)], axis=1)

    bias = jnp.concatenate([be, b1, b2, b_ulr, b3, b_qkv, bd], axis=1)   # (1, 1792) f32

    return {"wA": wA.astype(jnp.bfloat16),
            "wB": wB.astype(jnp.bfloat16),
            "wC": wd.astype(jnp.bfloat16),
            "bias": bias}


# ---------------------------------------------------------------- jitted forward
@jax.jit
def spectra_forward(x, mask_idx, params):
    B, s, feat = x.shape
    P = PATCH_SIZE
    NP = s // P
    nf = feat // P                    # torch unfold(dim=2, size=P, step=P), feat % P == 0
    d = P * feat
    S = NP + 1                        # cls + patches
    SP = ((S + 15) // 16) * 16        # pad to full sublane tiles (unmasked vst / clean vregs)
    inner = P_FACTOR * d
    hid = HEADS * DIM_HEAD

    # AudioPatcher relayout (tiny XLA glue; fuses with the pad below into one fusion).
    # TODO(synk): folding this regroup into the kernel needs a non-rectangular per-patch
    # gather (each patch row is a (P, nf*P)-strided tile of x); left as wrapper glue.
    patches = x.reshape(B, s, nf, P).transpose(0, 2, 1, 3).reshape(B, NP, d)
    # zero cls row in front + zero padding rows up to SP (re-masked exactly in-kernel)
    patches_p = jnp.pad(patches, ((0, 0), (1, SP - 1 - NP), (0, 0)))       # (B, SP, d)

    wA, wB, wC, bias = params["wA"], params["wB"], params["wC"], params["bias"]
    WA, WBw, BT = wA.shape[1], wB.shape[1], bias.shape[1]

    grid_spec = pltpu.PrefetchScalarGridSpec(
        num_scalar_prefetch=1,                      # mask indices -> SMEM, read inside kernel
        grid=(B,),
        in_specs=[
            pl.BlockSpec((None, SP, d), lambda b, m: (b, 0, 0)),   # padded patches (batch-squeezed)
            pl.BlockSpec((d, WA), lambda b, m: (0, 0)),            # packed d-input weights (bf16)
            pl.BlockSpec((inner, WBw), lambda b, m: (0, 0)),       # packed q|k|v|o|i|f (bf16)
            pl.BlockSpec((hid, d), lambda b, m: (0, 0)),           # mLSTM down projection (bf16)
            pl.BlockSpec((1, BT), lambda b, m: (0, 0)),            # packed biases (f32)
        ],
        out_specs=pl.BlockSpec((None, SP, d), lambda b, m: (b, 0, 0)),
    )

    out = pl.pallas_call(
        functools.partial(_spectra_kernel, valid_rows=S),
        out_shape=jax.ShapeDtypeStruct((B, SP, d), jnp.float32),
        grid_spec=grid_spec,
        # batch elements are independent -> "parallel" lets v7x's two TensorCores split them;
        # on single-TC v5e/v6e the grid-invariant weight blocks are DMA'd only once.
        compiler_params=pltpu.CompilerParams(dimension_semantics=("parallel",)),
        cost_estimate=pl.CostEstimate(flops=21_000_000, transcendentals=12_000,
                                      bytes_accessed=1_400_000),
    )(mask_idx, patches_p, wA, wB, wC, bias)

    return out[:, :S]                 # drop the padding rows


if __name__ == "__main__":
    key = jax.random.PRNGKey(0)
    kx, kp, km = jax.random.split(key, 3)
    B, SEQ, FEAT = 2, 64, 16          # -> patches (2, 8, 128), tokens (2, 9, 128)
    d = PATCH_SIZE * FEAT
    NP = SEQ // PATCH_SIZE

    x = jax.random.normal(kx, (B, SEQ, FEAT), jnp.float32)
    params = init_spectra_params(kp, d)                       # packed once, outside the jit
    # mask_and_add_cls_token: one shared randperm over patches, indices shifted by +1 (cls)
    mask_idx = (jax.random.permutation(km, NP)[:min(NUM_MASKED, NP)] + 1).astype(jnp.int32)

    out = spectra_forward(x, mask_idx, params)
    jax.block_until_ready(out)
    assert out.shape == (B, NP + 1, d)
    print("KERNEL_OK")
</pallas_src>

<mosaic_0001>
module attributes {stable_mosaic.version = 11 : i64} {
  func.func @_spectra_kernel(%arg0: i32, %arg1: memref<4xi32, #tpu.memory_space<smem>>, %arg2: memref<1x16x128xf32, #tpu.memory_space<vmem>>, %arg3: memref<128x896xbf16, #tpu.memory_space<vmem>>, %arg4: memref<256x768xbf16, #tpu.memory_space<vmem>>, %arg5: memref<64x128xbf16, #tpu.memory_space<vmem>>, %arg6: memref<1x1792xf32, #tpu.memory_space<vmem>>, %arg7: memref<1x16x128xf32, #tpu.memory_space<vmem>>) attributes {dimension_semantics = [#tpu.dimension_semantics<parallel>], iteration_bounds = array<i64: 2>, scalar_prefetch = 1 : i64, scratch_operands = 0 : i64, tpu.core_type = #tpu.core_type<tc>, window_params = [{transform_indices = @transform_0, window_bounds = array<i64: 1, 16, 128>}, {pipeline_mode = #tpu.pipeline_mode<synchronous>, transform_indices = @transform_1, window_bounds = array<i64: 128, 896>}, {pipeline_mode = #tpu.pipeline_mode<synchronous>, transform_indices = @transform_2, window_bounds = array<i64: 256, 768>}, {pipeline_mode = #tpu.pipeline_mode<synchronous>, transform_indices = @transform_3, window_bounds = array<i64: 64, 128>}, {pipeline_mode = #tpu.pipeline_mode<synchronous>, transform_indices = @transform_4, window_bounds = array<i64: 1, 1792>}, {transform_indices = @transform_5, window_bounds = array<i64: 1, 16, 128>}]} {
    %c0 = arith.constant 0 : index
    %c0_0 = arith.constant 0 : index
    %c0_1 = arith.constant 0 : index
    %0 = vector.load %arg2[%c0, %c0_0, %c0_1] : memref<1x16x128xf32, #tpu.memory_space<vmem>>, vector<1x16x128xf32>
    %1 = vector.shape_cast %0 : vector<1x16x128xf32> to vector<16x128xf32>
    %2 = tpu.iota {dimensions = array<i32: 0>} : vector<16x1xi32>
    %c0_i32 = arith.constant 0 : i32
    %3 = vector.broadcast %c0_i32 : i32 to vector<16x1xi32>
    %4 = arith.cmpi sgt, %2, %3 : vector<16x1xi32>
    %c9_i32 = arith.constant 9 : i32
    %5 = vector.broadcast %c9_i32 : i32 to vector<16x1xi32>
    %6 = arith.cmpi slt, %2, %5 : vector<16x1xi32>
    %7 = arith.andi %4, %6 : vector<16x1xi1>
    %8 = arith.extui %7 : vector<16x1xi1> to vector<16x1xi32>
    %9 = arith.sitofp %8 : vector<16x1xi32> to vector<16x1xf32>
    %c0_2 = arith.constant 0 : index
    %10 = memref.load %arg1[%c0_2] : memref<4xi32, #tpu.memory_space<smem>>
    %11 = vector.broadcast %10 : i32 to vector<16x1xi32>
    %12 = arith.cmpi ne, %2, %11 : vector<16x1xi32>
    %13 = arith.extui %12 : vector<16x1xi1> to vector<16x1xi32>
    %14 = arith.sitofp %13 : vector<16x1xi32> to vector<16x1xf32>
    %15 = arith.mulf %9, %14 : vector<16x1xf32>
    %c1 = arith.constant 1 : index
    %16 = memref.load %arg1[%c1] : memref<4xi32, #tpu.memory_space<smem>>
    %17 = vector.broadcast %16 : i32 to vector<16x1xi32>
    %18 = arith.cmpi ne, %2, %17 : vector<16x1xi32>
    %19 = arith.extui %18 : vector<16x1xi1> to vector<16x1xi32>
    %20 = arith.sitofp %19 : vector<16x1xi32> to vector<16x1xf32>
    %21 = arith.mulf %15, %20 : vector<16x1xf32>
    %c2 = arith.constant 2 : index
    %22 = memref.load %arg1[%c2] : memref<4xi32, #tpu.memory_space<smem>>
    %23 = vector.broadcast %22 : i32 to vector<16x1xi32>
    %24 = arith.cmpi ne, %2, %23 : vector<16x1xi32>
    %25 = arith.extui %24 : vector<16x1xi1> to vector<16x1xi32>
    %26 = arith.sitofp %25 : vector<16x1xi32> to vector<16x1xf32>
    %27 = arith.mulf %21, %26 : vector<16x1xf32>
    %c3 = arith.constant 3 : index
    %28 = memref.load %arg1[%c3] : memref<4xi32, #tpu.memory_space<smem>>
    %29 = vector.broadcast %28 : i32 to vector<16x1xi32>
    %30 = arith.cmpi ne, %2, %29 : vector<16x1xi32>
    %31 = arith.extui %30 : vector<16x1xi1> to vector<16x1xi32>
    %32 = arith.sitofp %31 : vector<16x1xi32> to vector<16x1xf32>
    %33 = arith.mulf %27, %32 : vector<16x1xf32>
    %34 = arith.truncf %1 : vector<16x128xf32> to vector<16x128xbf16>
    %c0_3 = arith.constant 0 : index
    %c0_4 = arith.constant 0 : index
    %35 = vector.load %arg3[%c0_3, %c0_4] : memref<128x896xbf16, #tpu.memory_space<vmem>>, vector<128x128xbf16>
    %cst = arith.constant dense<0.000000e+00> : vector<16x128xf32>
    %36 = tpu.matmul %34, %35, %cst {dimension_numbers = #tpu.dot_dimension_numbers<[1], [0], [0], [1], [0, 0, 1, 1], [], []>} : vector<16x128xbf16>, vector<128x128xbf16>, vector<16x128xf32> -> vector<16x128xf32>
    %c0_5 = arith.constant 0 : index
    %c0_6 = arith.constant 0 : index
    %37 = vector.load %arg6[%c0_5, %c0_6] : memref<1x1792xf32, #tpu.memory_space<vmem>>, vector<1x128xf32>
    %38 = vector.broadcast %37 : vector<1x128xf32> to vector<16x128xf32>
    %39 = arith.addf %36, %38 : vector<16x128xf32>
    %40 = vector.broadcast %33 : vector<16x1xf32> to vector<16x128xf32>
    %41 = arith.mulf %39, %40 : vector<16x128xf32>
    %cst_7 = arith.constant dense<0.000000e+00> : vector<16xf32>
    %42 = vector.multi_reduction <add>, %41, %cst_7 [1] : vector<16x128xf32> to vector<16xf32>
    %43 = vector.shape_cast %42 : vector<16xf32> to vector<16x1xf32>
    %cst_8 = arith.constant 1.280000e+02 : f32
    %44 = vector.broadcast %cst_8 : f32 to vector<16x1xf32>
    %45 = arith.divf %43, %44 : vector<16x1xf32>
    %46 = vector.broadcast %45 : vector<16x1xf32> to vector<16x128xf32>
    %47 = arith.subf %41, %46 : vector<16x128xf32>
    %48 = arith.mulf %47, %47 : vector<16x128xf32>
    %cst_9 = arith.constant dense<0.000000e+00> : vector<16xf32>
    %49 = vector.multi_reduction <add>, %48, %cst_9 [1] : vector<16x128xf32> to vector<16xf32>
    %50 = vector.shape_cast %49 : vector<16xf32> to vector<16x1xf32>
    %cst_10 = arith.constant 1.280000e+02 : f32
    %51 = vector.broadcast %cst_10 : f32 to vector<16x1xf32>
    %52 = arith.divf %50, %51 : vector<16x1xf32>
    %53 = vector.broadcast %45 : vector<16x1xf32> to vector<16x128xf32>
    %54 = arith.subf %41, %53 : vector<16x128xf32>
    %cst_11 = arith.constant 9.99999974E-6 : f32
    %55 = vector.broadcast %cst_11 : f32 to vector<16x1xf32>
    %56 = arith.addf %52, %55 : vector<16x1xf32>
    %57 = math.rsqrt %56 : vector<16x1xf32>
    %58 = vector.broadcast %57 : vector<16x1xf32> to vector<16x128xf32>
    %59 = arith.mulf %54, %58 : vector<16x128xf32>
    %60 = arith.truncf %59 : vector<16x128xf32> to vector<16x128xbf16>
    %c0_12 = arith.constant 0 : index
    %c128 = arith.constant 128 : index
    %61 = vector.load %arg3[%c0_12, %c128] : memref<128x896xbf16, #tpu.memory_space<vmem>>, vector<128x256xbf16>
    %cst_13 = arith.constant dense<0.000000e+00> : vector<16x256xf32>
    %62 = tpu.matmul %60, %61, %cst_13 {dimension_numbers = #tpu.dot_dimension_numbers<[1], [0], [0], [1], [0, 0, 1, 1], [], []>} : vector<16x128xbf16>, vector<128x256xbf16>, vector<16x256xf32> -> vector<16x256xf32>
    %c0_14 = arith.constant 0 : index
    %c128_15 = arith.constant 128 : index
    %63 = vector.load %arg6[%c0_14, %c128_15] : memref<1x1792xf32, #tpu.memory_space<vmem>>, vector<1x256xf32>
    %64 = vector.broadcast %63 : vector<1x256xf32> to vector<16x256xf32>
    %65 = arith.addf %62, %64 : vector<16x256xf32>
    %66 = vector.extract_strided_slice %65 {offsets = [0, 0], sizes = [16, 128], strides = [1, 1]} : vector<16x256xf32> to vector<16x128xf32>
    %67 = vector.extract_strided_slice %65 {offsets = [0, 128], sizes = [16, 128], strides = [1, 1]} : vector<16x256xf32> to vector<16x128xf32>
    %68 = arith.negf %67 : vector<16x128xf32>
    %69 = math.exp %68 : vector<16x128xf32>
    %cst_16 = arith.constant 1.000000e+00 : f32
    %70 = vector.broadcast %cst_16 : f32 to vector<16x128xf32>
    %71 = arith.addf %70, %69 : vector<16x128xf32>
    %72 = arith.divf %70, %71 : vector<16x128xf32>
    %73 = arith.mulf %67, %72 : vector<16x128xf32>
    %cst_17 = arith.constant dense<0.000000e+00> : vector<16xf32>
    %74 = vector.multi_reduction <add>, %66, %cst_17 [1] : vector<16x128xf32> to vector<16xf32>
    %75 = vector.shape_cast %74 : vector<16xf32> to vector<16x1xf32>
    %cst_18 = arith.constant 1.280000e+02 : f32
    %76 = vector.broadcast %cst_18 : f32 to vector<16x1xf32>
    %77 = arith.divf %75, %76 : vector<16x1xf32>
    %78 = vector.broadcast %77 : vector<16x1xf32> to vector<16x128xf32>
    %79 = arith.subf %66, %78 : vector<16x128xf32>
    %80 = arith.mulf %79, %79 : vector<16x128xf32>
    %cst_19 = arith.constant dense<0.000000e+00> : vector<16xf32>
    %81 = vector.multi_reduction <add>, %80, %cst_19 [1] : vector<16x128xf32> to vector<16xf32>
    %82 = vector.shape_cast %81 : vector<16xf32> to vector<16x1xf32>
    %cst_20 = arith.constant 1.280000e+02 : f32
    %83 = vector.broadcast %cst_20 : f32 to vector<16x1xf32>
    %84 = arith.divf %82, %83 : vector<16x1xf32>
    %85 = vector.broadcast %77 : vector<16x1xf32> to vector<16x128xf32>
    %86 = arith.subf %66, %85 : vector<16x128xf32>
    %cst_21 = arith.constant 9.99999974E-6 : f32
    %87 = vector.broadcast %cst_21 : f32 to vector<16x1xf32>
    %88 = arith.addf %84, %87 : vector<16x1xf32>
    %89 = math.rsqrt %88 : vector<16x1xf32>
    %90 = vector.broadcast %89 : vector<16x1xf32> to vector<16x128xf32>
    %91 = arith.mulf %86, %90 : vector<16x128xf32>
    %92 = arith.truncf %91 : vector<16x128xf32> to vector<16x128xbf16>
    %c0_22 = arith.constant 0 : index
    %c384 = arith.constant 384 : index
    %93 = vector.load %arg3[%c0_22, %c384] : memref<128x896xbf16, #tpu.memory_space<vmem>>, vector<128x384xbf16>
    %cst_23 = arith.constant dense<0.000000e+00> : vector<16x384xf32>
    %94 = tpu.matmul %92, %93, %cst_23 {dimension_numbers = #tpu.dot_dimension_numbers<[1], [0], [0], [1], [0, 0, 1, 1], [], []>} : vector<16x128xbf16>, vector<128x384xbf16>, vector<16x384xf32> -> vector<16x384xf32>
    %c0_24 = arith.constant 0 : index
    %c384_25 = arith.constant 384 : index
    %95 = vector.load %arg6[%c0_24, %c384_25] : memref<1x1792xf32, #tpu.memory_space<vmem>>, vector<1x384xf32>
    %96 = vector.broadcast %95 : vector<1x384xf32> to vector<16x384xf32>
    %97 = arith.addf %94, %96 : vector<16x384xf32>
    %98 = vector.extract_strided_slice %97 {offsets = [0, 0], sizes = [16, 256], strides = [1, 1]} : vector<16x384xf32> to vector<16x256xf32>
    %99 = vector.extract_strided_slice %97 {offsets = [0, 256], sizes = [16, 64], strides = [1, 1]} : vector<16x384xf32> to vector<16x64xf32>
    %100 = arith.truncf %98 : vector<16x256xf32> to vector<16x256xbf16>
    %c0_26 = arith.constant 0 : index
    %c0_27 = arith.constant 0 : index
    %101 = vector.load %arg4[%c0_26, %c0_27] : memref<256x768xbf16, #tpu.memory_space<vmem>>, vector<256x768xbf16>
    %cst_28 = arith.constant dense<0.000000e+00> : vector<16x768xf32>
    %102 = tpu.matmul %100, %101, %cst_28 {dimension_numbers = #tpu.dot_dimension_numbers<[1], [0], [0], [1], [0, 0, 1, 1], [], []>} : vector<16x256xbf16>, vector<256x768xbf16>, vector<16x768xf32> -> vector<16x768xf32>
    %c0_29 = arith.constant 0 : index
    %c896 = arith.constant 896 : index
    %103 = vector.load %arg6[%c0_29, %c896] : memref<1x1792xf32, #tpu.memory_space<vmem>>, vector<1x768xf32>
    %104 = vector.broadcast %103 : vector<1x768xf32> to vector<16x768xf32>
    %105 = arith.addf %102, %104 : vector<16x768xf32>
    %106 = vector.extract_strided_slice %105 {offsets = [0, 0], sizes = [16, 64], strides = [1, 1]} : vector<16x768xf32> to vector<16x64xf32>
    %107 = vector.extract_strided_slice %105 {offsets = [0, 128], sizes = [16, 64], strides = [1, 1]} : vector<16x768xf32> to vector<16x64xf32>
    %cst_30 = arith.constant 6.400000e+01 : f32
    %108 = math.sqrt %cst_30 : f32
    %cst_31 = arith.constant 1.000000e+00 : f32
    %109 = arith.divf %cst_31, %108 : f32
    %110 = vector.broadcast %109 : f32 to vector<16x64xf32>
    %111 = arith.mulf %107, %110 : vector<16x64xf32>
    %112 = vector.extract_strided_slice %105 {offsets = [0, 256], sizes = [16, 64], strides = [1, 1]} : vector<16x768xf32> to vector<16x64xf32>
    %113 = vector.extract_strided_slice %105 {offsets = [0, 384], sizes = [16, 64], strides = [1, 1]} : vector<16x768xf32> to vector<16x64xf32>
    %114 = arith.negf %113 : vector<16x64xf32>
    %115 = math.exp %114 : vector<16x64xf32>
    %cst_32 = arith.constant 1.000000e+00 : f32
    %116 = vector.broadcast %cst_32 : f32 to vector<16x64xf32>
    %117 = arith.addf %116, %115 : vector<16x64xf32>
    %118 = arith.divf %116, %117 : vector<16x64xf32>
    %119 = vector.extract_strided_slice %105 {offsets = [0, 512], sizes = [16, 1], strides = [1, 1]} : vector<16x768xf32> to vector<16x1xf32>
    %120 = vector.extract_strided_slice %105 {offsets = [0, 640], sizes = [16, 1], strides = [1, 1]} : vector<16x768xf32> to vector<16x1xf32>
    %121 = tpu.iota {dimensions = array<i32: 0>} : vector<16x16xi32>
    %122 = tpu.iota {dimensions = array<i32: 1>} : vector<16x16xi32>
    %123 = arith.cmpi sge, %121, %122 : vector<16x16xi32>
    %124 = arith.extui %123 : vector<16x16xi1> to vector<16x16xi32>
    %125 = arith.sitofp %124 : vector<16x16xi32> to vector<16x16xf32>
    %126 = arith.cmpi sgt, %121, %122 : vector<16x16xi32>
    %127 = arith.extui %126 : vector<16x16xi1> to vector<16x16xi32>
    %128 = arith.sitofp %127 : vector<16x16xi32> to vector<16x16xf32>
    %129 = vector.broadcast %120 : vector<16x1xf32> to vector<16x16xf32>
    %130 = arith.mulf %129, %128 : vector<16x16xf32>
    %131 = arith.cmpi eq, %121, %122 : vector<16x16xi32>
    %132 = arith.extui %131 : vector<16x16xi1> to vector<16x16xi32>
    %133 = arith.sitofp %132 : vector<16x16xi32> to vector<16x16xf32>
    %134 = vector.broadcast %119 : vector<16x1xf32> to vector<16x16xf32>
    %135 = arith.mulf %134, %133 : vector<16x16xf32>
    %136 = arith.addf %130, %135 : vector<16x16xf32>
    %cst_33 = arith.constant dense<0.000000e+00> : vector<16x16xf32>
    %137 = tpu.matmul %125, %136, %cst_33 {dimension_numbers = #tpu.dot_dimension_numbers<[1], [0], [0], [1], [0, 0, 1, 1], [], []>} : vector<16x16xf32>, vector<16x16xf32>, vector<16x16xf32> -> vector<16x16xf32>
    %cst_34 = arith.constant dense<0.000000e+00> : vector<16x1xf32>
    %138 = tpu.matmul %125, %120, %cst_34 {dimension_numbers = #tpu.dot_dimension_numbers<[1], [0], [0], [1], [0, 0, 1, 1], [], []>} : vector<16x16xf32>, vector<16x1xf32>, vector<16x1xf32> -> vector<16x1xf32>
    %cst_35 = arith.constant -1.000000e+30 : f32
    %139 = vector.broadcast %cst_35 : f32 to vector<16x16xf32>
    %140 = arith.select %123, %137, %139 : vector<16x16xi1>, vector<16x16xf32>
    %cst_36 = arith.constant dense<0xFF800000> : vector<16xf32>
    %141 = vector.multi_reduction <maximumf>, %140, %cst_36 [1] : vector<16x16xf32> to vector<16xf32>
    %142 = vector.shape_cast %141 : vector<16xf32> to vector<16x1xf32>
    %143 = arith.maximumf %142, %138 : vector<16x1xf32>
    %144 = vector.broadcast %143 : vector<16x1xf32> to vector<16x16xf32>
    %145 = arith.subf %137, %144 : vector<16x16xf32>
    %146 = math.exp %145 : vector<16x16xf32>
    %cst_37 = arith.constant 0.000000e+00 : f32
    %147 = vector.broadcast %cst_37 : f32 to vector<16x16xf32>
    %148 = arith.select %123, %146, %147 : vector<16x16xi1>, vector<16x16xf32>
    %149 = arith.truncf %106 : vector<16x64xf32> to vector<16x64xbf16>
    %150 = arith.truncf %111 : vector<16x64xf32> to vector<16x64xbf16>
    %cst_38 = arith.constant dense<0.000000e+00> : vector<16x16xf32>
    %151 = tpu.matmul %149, %150, %cst_38 {dimension_numbers = #tpu.dot_dimension_numbers<[1], [1], [0], [0], [0, 0, 1, 0], [], []>} : vector<16x64xbf16>, vector<16x64xbf16>, vector<16x16xf32> -> vector<16x16xf32>
    %152 = arith.mulf %151, %148 : vector<16x16xf32>
    %cst_39 = arith.constant dense<0.000000e+00> : vector<16xf32>
    %153 = vector.multi_reduction <add>, %152, %cst_39 [1] : vector<16x16xf32> to vector<16xf32>
    %154 = vector.shape_cast %153 : vector<16xf32> to vector<16x1xf32>
    %155 = math.absf %154 : vector<16x1xf32>
    %cst_40 = arith.constant 0.000000e+00 : f32
    %156 = vector.broadcast %cst_40 : f32 to vector<16x1xf32>
    %157 = arith.subf %156, %143 : vector<16x1xf32>
    %158 = math.exp %157 : vector<16x1xf32>
    %159 = arith.maximumf %155, %158 : vector<16x1xf32>
    %160 = arith.truncf %152 : vector<16x16xf32> to vector<16x16xbf16>
    %161 = arith.truncf %112 : vector<16x64xf32> to vector<16x64xbf16>
    %cst_41 = arith.constant dense<0.000000e+00> : vector<16x64xf32>
    %162 = tpu.matmul %160, %161, %cst_41 {dimension_numbers = #tpu.dot_dimension_numbers<[1], [0], [0], [1], [0, 0, 1, 1], [], []>} : vector<16x16xbf16>, vector<16x64xbf16>, vector<16x64xf32> -> vector<16x64xf32>
    %163 = arith.mulf %118, %162 : vector<16x64xf32>
    %164 = vector.broadcast %159 : vector<16x1xf32> to vector<16x64xf32>
    %165 = arith.divf %163, %164 : vector<16x64xf32>
    %cst_42 = arith.constant dense<0.000000e+00> : vector<16xf32>
    %166 = vector.multi_reduction <add>, %165, %cst_42 [1] : vector<16x64xf32> to vector<16xf32>
    %167 = vector.shape_cast %166 : vector<16xf32> to vector<16x1xf32>
    %cst_43 = arith.constant 6.400000e+01 : f32
    %168 = vector.broadcast %cst_43 : f32 to vector<16x1xf32>
    %169 = arith.divf %167, %168 : vector<16x1xf32>
    %170 = vector.broadcast %169 : vector<16x1xf32> to vector<16x64xf32>
    %171 = arith.subf %165, %170 : vector<16x64xf32>
    %172 = arith.mulf %171, %171 : vector<16x64xf32>
    %cst_44 = arith.constant dense<0.000000e+00> : vector<16xf32>
    %173 = vector.multi_reduction <add>, %172, %cst_44 [1] : vector<16x64xf32> to vector<16xf32>
    %174 = vector.shape_cast %173 : vector<16xf32> to vector<16x1xf32>
    %cst_45 = arith.constant 6.400000e+01 : f32
    %175 = vector.broadcast %cst_45 : f32 to vector<16x1xf32>
    %176 = arith.divf %174, %175 : vector<16x1xf32>
    %177 = vector.broadcast %169 : vector<16x1xf32> to vector<16x64xf32>
    %178 = arith.subf %165, %177 : vector<16x64xf32>
    %cst_46 = arith.constant 9.99999974E-6 : f32
    %179 = vector.broadcast %cst_46 : f32 to vector<16x1xf32>
    %180 = arith.addf %176, %179 : vector<16x1xf32>
    %181 = math.rsqrt %180 : vector<16x1xf32>
    %182 = vector.broadcast %181 : vector<16x1xf32> to vector<16x64xf32>
    %183 = arith.mulf %178, %182 : vector<16x64xf32>
    %184 = arith.negf %99 : vector<16x64xf32>
    %185 = math.exp %184 : vector<16x64xf32>
    %cst_47 = arith.constant 1.000000e+00 : f32
    %186 = vector.broadcast %cst_47 : f32 to vector<16x64xf32>
    %187 = arith.addf %186, %185 : vector<16x64xf32>
    %188 = arith.divf %186, %187 : vector<16x64xf32>
    %189 = arith.mulf %99, %188 : vector<16x64xf32>
    %190 = arith.mulf %183, %189 : vector<16x64xf32>
    %191 = arith.truncf %190 : vector<16x64xf32> to vector<16x64xbf16>
    %c0_48 = arith.constant 0 : index
    %c0_49 = arith.constant 0 : index
    %192 = vector.load %arg5[%c0_48, %c0_49] : memref<64x128xbf16, #tpu.memory_space<vmem>>, vector<64x128xbf16>
    %cst_50 = arith.constant dense<0.000000e+00> : vector<16x128xf32>
    %193 = tpu.matmul %191, %192, %cst_50 {dimension_numbers = #tpu.dot_dimension_numbers<[1], [0], [0], [1], [0, 0, 1, 1], [], []>} : vector<16x64xbf16>, vector<64x128xbf16>, vector<16x128xf32> -> vector<16x128xf32>
    %c0_51 = arith.constant 0 : index
    %c1664 = arith.constant 1664 : index
    %194 = vector.load %arg6[%c0_51, %c1664] : memref<1x1792xf32, #tpu.memory_space<vmem>>, vector<1x128xf32>
    %195 = vector.broadcast %194 : vector<1x128xf32> to vector<16x128xf32>
    %196 = arith.addf %193, %195 : vector<16x128xf32>
    %197 = arith.addf %196, %66 : vector<16x128xf32>
    %198 = arith.mulf %197, %73 : vector<16x128xf32>
    %199 = arith.truncf %198 : vector<16x128xf32> to vector<16x128xbf16>
    %c0_52 = arith.constant 0 : index
    %c768 = arith.constant 768 : index
    %200 = vector.load %arg3[%c0_52, %c768] : memref<128x896xbf16, #tpu.memory_space<vmem>>, vector<128x128xbf16>
    %cst_53 = arith.constant dense<0.000000e+00> : vector<16x128xf32>
    %201 = tpu.matmul %199, %200, %cst_53 {dimension_numbers = #tpu.dot_dimension_numbers<[1], [0], [0], [1], [0, 0, 1, 1], [], []>} : vector<16x128xbf16>, vector<128x128xbf16>, vector<16x128xf32> -> vector<16x128xf32>
    %c0_54 = arith.constant 0 : index
    %c768_55 = arith.constant 768 : index
    %202 = vector.load %arg6[%c0_54, %c768_55] : memref<1x1792xf32, #tpu.memory_space<vmem>>, vector<1x128xf32>
    %203 = vector.broadcast %202 : vector<1x128xf32> to vector<16x128xf32>
    %204 = arith.addf %201, %203 : vector<16x128xf32>
    %205 = arith.addf %204, %41 : vector<16x128xf32>
    %c0_56 = arith.constant 0 : index
    %c0_57 = arith.constant 0 : index
    %c0_58 = arith.constant 0 : index
    %206 = vector.load %arg7[%c0_56, %c0_57, %c0_58] : memref<1x16x128xf32, #tpu.memory_space<vmem>>, vector<1x16x128xf32>
    %207 = vector.shape_cast %206 : vector<1x16x128xf32> to vector<16x128xf32>
    %208 = vector.shape_cast %205 : vector<16x128xf32> to vector<1x16x128xf32>
    tpu.vector_store %arg7[%c0_56, %c0_57, %c0_58], %208 {strides = array<i32>} : memref<1x16x128xf32, #tpu.memory_space<vmem>>, vector<1x16x128xf32>,
    return
  }
  func.func @transform_0(%arg0: i32, %arg1: memref<4xi32, #tpu.memory_space<smem>>) -> (i32, i32, i32) {
    %c0_i32 = arith.constant 0 : i32
    %c0_i32_0 = arith.constant 0 : i32
    %c0_i32_1 = arith.constant 0 : i32
    return %arg0, %c0_i32, %c0_i32_0 : i32, i32, i32
  }
  func.func @transform_1(%arg0: i32, %arg1: memref<4xi32, #tpu.memory_space<smem>>) -> (i32, i32) {
    %c0_i32 = arith.constant 0 : i32
    %c0_i32_0 = arith.constant 0 : i32
    %c0_i32_1 = arith.constant 0 : i32
    return %c0_i32, %c0_i32_0 : i32, i32
  }
  func.func @transform_2(%arg0: i32, %arg1: memref<4xi32, #tpu.memory_space<smem>>) -> (i32, i32) {
    %c0_i32 = arith.constant 0 : i32
    %c0_i32_0 = arith.constant 0 : i32
    %c0_i32_1 = arith.constant 0 : i32
    return %c0_i32, %c0_i32_0 : i32, i32
  }
  func.func @transform_3(%arg0: i32, %arg1: memref<4xi32, #tpu.memory_space<smem>>) -> (i32, i32) {
    %c0_i32 = arith.constant 0 : i32
    %c0_i32_0 = arith.constant 0 : i32
    %c0_i32_1 = arith.constant 0 : i32
    return %c0_i32, %c0_i32_0 : i32, i32
  }
  func.func @transform_4(%arg0: i32, %arg1: memref<4xi32, #tpu.memory_space<smem>>) -> (i32, i32) {
    %c0_i32 = arith.constant 0 : i32
    %c0_i32_0 = arith.constant 0 : i32
    %c0_i32_1 = arith.constant 0 : i32
    return %c0_i32, %c0_i32_0 : i32, i32
  }
  func.func @transform_5(%arg0: i32, %arg1: memref<4xi32, #tpu.memory_space<smem>>) -> (i32, i32, i32) {
    %c0_i32 = arith.constant 0 : i32
    %c0_i32_0 = arith.constant 0 : i32
    %c0_i32_1 = arith.constant 0 : i32
    return %arg0, %c0_i32, %c0_i32_0 : i32, i32, i32
  }
}

</mosaic_0001>

<bundles_post_ra>
// kernel: spectra_forward.1
= control target key start
LH: loop header
LB: loop body
LE: loop exit
PB: predicated region body
PF: predicated region fallthrough
CT: control target
= control target key end

     0   :  { %s3534_s0 = inlined_call_operand.vmem [shape: s32[4], index: 0, kind: input, shape index: {}]   ;;  %s3535_s1 = inlined_call_operand.vmem [shape: f32[2,16,128], index: 1, kind: input, shape index: {}]   ;;  %s3536_s2 = inlined_call_operand.vmem [shape: bf16[128,896], index: 2, kind: input, shape index: {}]   ;;  %s3537_s3 = inlined_call_operand.hbm [shape: bf16[256,768], index: 3, kind: input, shape index: {}]   ;;  %s3538_s4 = inlined_call_operand.vmem [shape: bf16[64,128], index: 4, kind: input, shape index: {}]   ;;  %s3539_s5 = inlined_call_operand.vmem [shape: f32[1,1792], index: 5, kind: input, shape index: {}]   ;;  %s3540_s6 = inlined_call_operand.vmem [shape: f32[2,16,128], index: 6, kind: output, shape index: {}]  }
   0x1   :  { %s11_s23 = sshll.u32 %s3534_s0, 4  ;;  %s12_s23 = int_to_ptr.vmem [resolvable:$true] %s11_s23 }
   0x2   :  { %s2972_s24 = scalar_lea.vmem %s12_s23, 16  ;;  %p2977_p1 = scmp.lt.s32.totalorder %s12_s23, %s12_s23 }
   0x3   :  { %p2973_p0 = scmp.ne.s32.totalorder %s12_s23, %s2972_s24  ;;  %p2978_p2 = scmp.lt.s32.totalorder %s2972_s24, %s2972_s24 }
   0x5   :  { %p2979_p3 = por %p2978_p2, %p2977_p1 }
   0x7   :  { %p2980_p4 = pnand %p2979_p3, %p2973_p0 }
   0x9   :  { %2983 = shalt.err (!%p2980_p4)  }
   0xa   :  { %s3026_s25 = smov [#allocation3]  }
   0xb   :  { %14 = dma.vmem_to_smem %s12_s23, 16, %s3026_s25, [#allocation2] }
   0xc   :  { %3016 = dma.done.wait [#allocation2], 16 }
   0xd   :  { %3017 = vsyncadd [#allocation2], 4294967280 }
   0xe   :  { %16 = sfence }
   0xf   :  { %17 = vsyncpa [#allocation5], 0  ;;  %s3071_s26 = smov 0  }
  0x10 LB: > { %s3077_s0 = sadd.s32 4294967295, %s3024_s26   ;;  %p2322_p5 = scmp.ge.s32.totalorder %s3024_s26, 1  ;;  %s3024_s26 = sphi %s3071_s26, %s23_s26  }
  0x11   : > { %p164_p6 = scmp.lt.s32.totalorder %s3024_s26, 3  ;;  %s3027_s27 = smov [#allocation4]  }
  0x12   : > { %s179_s28 = sshll.u32 %s3027_s27, 4  ;;  %p3541_p8 = scmp.eq.s32.totalorder %s3077_s0, 0  ;;  %s180_s28 = int_to_ptr.vmem [resolvable:$true] %s179_s28 }
  0x13   : > { %p3081_p7 = pnand %p2322_p5, %p164_p6  ;;  %s2984_s9 = scalar_lea.hbm %s3537_s3, 12288 }
  0x14   : > { %p2985_p11 = scmp.ne.s32.totalorder %s3537_s3, %s2984_s9  ;;  %p2991_p1 = scmp.lt.u32.totalorder %s2984_s9, %s3537_s3 }
  0x15   : > { %s3543_s29 = scalar_select %p3081_p7, 1, 0 }
  0x16   : > { %p2680_p9 = pneg %p3081_p7 }
  0x18   : > { %p3090_p10 = pnand %p3541_p8, %p2680_p9 }
  0x1a   : > { %p2986_p12 = pneg %p3090_p10 }
  0x1c   : > { %p2987_p13 = pnand %p2986_p12, %p2985_p11 }
  0x1e   : > { %p2988_p0 = pneg %p2987_p13 }
  0x20   : > { %p2993_p2 = pnand %p2991_p1, %p2988_p0 }
  0x22   : > { %2996 = shalt.err (!%p2993_p2)
}
  0x23   : > { %s2997_s14 = scalar_lea.vmem %s180_s28, 12288  ;;  %p3005_p6 = scmp.lt.s32.totalorder %s180_s28, %s180_s28 }
  0x24   : > { %p2998_p3 = scmp.ne.s32.totalorder %s180_s28, %s2997_s14  ;;  %p3006_p9 = scmp.lt.s32.totalorder %s2997_s14, %s2997_s14 }
  0x26   : > { %p3000_p4 = pnand %p2998_p3, %p2986_p12  ;;  %p3007_p8 = por %p3006_p9, %p3005_p6 }
  0x28   : > { %p3001_p5 = pneg %p3000_p4 }
  0x2a   : > { %p3008_p7 = pnand %p3007_p8, %p3001_p5 }
  0x2c   : > { %3011 = shalt.err (!%p3008_p7)
}
  0x2d   : > { %s3028_s15 = smov 384   ;;  %s3029_s16 = smov 24  }
  0x2e   : > { %2683 = dma.hbm_to_vmem [thread:$0]  (!%p3090_p10), %s3537_s3, 12288, %s180_s28, [#allocation5], %s3028_s15, %s3028_s15, %s3029_s16  }
  0x2f   : > { %p3545_p11 = scmp.ne.s32.totalorder %s3543_s29, 0 }
  0x30   : > { %p3546_p13 = scmp.eq.s32.totalorder (!%p3545_p11), %s3077_s0, 0 }
  0x31   : > { %209 = sbr.rel (%p3545_p11) target bundleno = 3339 (0xd0b), region = 40 }
  0x38   : > { %3019 = dma.done.wait (%p3546_p13), [#allocation5], 12288   ;;  %p3547_p12 = pmov %p3546_p13 }
  0x39   : > { %v3030_v0 = vmov 0.0   ;;  %vm3031_vm0 = vmmov 0   ;;  %v2703_v1 = vld [vmem:[%s3536_s2] ss:$28 sps:$4 sm:$0xff]   ;;  %v2704_v2 = vld [vmem:[%s3536_s2 + $0x38] ss:$28 sps:$4 sm:$0xff]   ;;  %v250_v12 = vlaneseq }
  0x3a   : > { %3021 = vsyncadd (%p3547_p12), [#allocation5], 4294955008  ;;  %2570 = vmatprep.subr.bf16.mxu0 %v3030_v0  ;;  %2586 = vmatprep.mubr.msk.bf16.mxu0 %vm3031_vm0, %v3030_v0  ;;  %v2705_v3 = vld [vmem:[%s3536_s2 + $0x70] ss:$28 sps:$4 sm:$0xff]   ;;  %v2706_v4 = vld [vmem:[%s3536_s2 + $0xa8] ss:$28 sps:$4 sm:$0xff]  }
  0x3b   : > { %2571 = vmatpush3.bf16.msra.mxu0 %v2703_v1  ;;  %p237_p7 = scmp.lt.s32.totalorder %s3077_s0, 1  ;;  %v2707_v5 = vld [vmem:[%s3536_s2 + $0xe0] ss:$28 sps:$4 sm:$0xff]   ;;  %v2708_v6 = vld [vmem:[%s3536_s2 + $0x118] ss:$28 sps:$4 sm:$0xff]   ;;  %s263_s16 = sld [smem:[#allocation3]] }
  0x3c   : > { %2572 = vmatprep.subr.bf16.mxu0 %v3030_v0  ;;  %v2709_v7 = vld [vmem:[%s3536_s2 + $0x150] ss:$28 sps:$4 sm:$0xff]   ;;  %v2710_v8 = vld [vmem:[%s3536_s2 + $0x188] ss:$28 sps:$4 sm:$0xff]   ;;  %s2335_s17 = sld [smem:[#allocation3 + $0x1]]  ;;  %v3161_v13 = vshrl.u32 %v250_v12, 7 }
  0x3d   : > { %s3549_s0 = smov (!%p237_p7, %s3077_s0), 1  ;;  %s2338_s18 = sld [smem:[#allocation3 + $0x2]]  ;;  %v2344_v33 = vld [vmem:[%s3539_s5] ss:$0 sm:$0xff]  ;;  %v2711_v46 = vld [vmem:[%s3536_s2 + $0x8] ss:$28 sps:$4 sm:$0xff]  }
  0x3e   : > { %s2524_s8 = sshll.u32 %s3549_s0, 4  ;;  %vm253_vm1 = vcmp.gt.s32.totalorder %v3161_v13, 0  ;;  %v3166_v15 = vadd.s32 8, %v3161_v13  ;;  %s2341_s19 = sld [smem:[#allocation3 + $0x3]]  ;;  %v2713_v47 = vld [vmem:[%s3536_s2 + $0x4] ss:$28 sps:$4 sm:$0xff]   ;;  %550 = vmatprep.subr.bf16.mxu1 %v2711_v46 }
  0x3f   : > { %2573 = vmatpush3.bf16.msra.mxu0 %v2704_v2  ;;  %s241_s13 = scalar_lea.vmem %s3535_s1, %s2524_s8  ;;  %v2331_v17 = vsel %vm253_vm1, 1.0, %v3030_v0  ;;  %v2714_v48 = vld [vmem:[%s3536_s2 + $0x40] ss:$28 sps:$4 sm:$0xff]   ;;  %551 = vmatpush1.bf16.msra.mxu1 %v2713_v47  ;;  %v2717_v50 = vld [vmem:[%s3536_s2 + $0x78] ss:$28 sps:$4 sm:$0xff]   ;;  %vm1690_vm11 = vcmask 130048   ;;  %s246_s7 = scalar_lea.vmem %s3540_s6, %s2524_s8 }
  0x40   : > { %2574 = vmatprep.subr.bf16.mxu0 %v3030_v0  ;;  %v248_v9 = vld [vmem:[%s241_s13] sm:$0xff]  ;;  %v249_v10 = vld [vmem:[%s241_s13 + $0x8] sm:$0xff]  ;;  %vm256_vm4 = vcmp.lt.s32.totalorder %v3166_v15, 9  ;;  %v2716_v49 = vld [vmem:[%s3536_s2 + $0x3c] ss:$28 sps:$4 sm:$0xff]   ;;  %552 = vmatprep.subr.bf16.mxu1 %v2714_v48  ;;  %vm1877_vm14 = vcmask 523264  }
  0x41   : > { %v303_v11 = vpack.c.bf16 %v249_v10, %v248_v9  ;;  %v264_v14 = vstv %s263_s16  ;;  %v2332_v22 = vsel %vm256_vm4, 1.0, %v3030_v0  ;;  %v2719_v59 = vld [vmem:[%s3536_s2 + $0x74] ss:$28 sps:$4 sm:$0xff]   ;;  %v2722_v61 = vld [vmem:[%s3536_s2 + $0xac] ss:$28 sps:$4 sm:$0xff]  }
  0x42   : > { %vm265_vm2 = vcmp.ne.s32.totalorder %v3161_v13, %v264_v14  ;;  %v274_v16 = vstv %s2335_s17  ;;  %vm266_vm5 = vcmp.ne.s32.totalorder %v3166_v15, %v264_v14  ;;  %v2720_v60 = vld [vmem:[%s3536_s2 + $0xb0] ss:$28 sps:$4 sm:$0xff]   ;;  %v2723_v62 = vld [vmem:[%s3536_s2 + $0xe8] ss:$28 sps:$4 sm:$0xff]   ;;  %v2726_v1 = vld [vmem:[%s3536_s2 + $0x120] ss:$28 sps:$4 sm:$0xff]  }
  0x43   : > { %2575 = vmatpush3.bf16.msra.mxu0 %v2705_v3  ;;  %v2333_v18 = vsel %vm265_vm2, 1.0, %v3030_v0  ;;  %vm275_vm3 = vcmp.ne.s32.totalorder %v3161_v13, %v274_v16  ;;  %v284_v19 = vstv %s2338_s18  ;;  %v2334_v23 = vsel %vm266_vm5, 1.0, %v3030_v0  ;;  %553 = vmatpush1.bf16.msra.mxu1 %v2716_v49  ;;  %v2725_v63 = vld [vmem:[%s3536_s2 + $0xe4] ss:$28 sps:$4 sm:$0xff]   ;;  %v2728_v2 = vld [vmem:[%s3536_s2 + $0x11c] ss:$28 sps:$4 sm:$0xff]  }
  0x44   : > { %2576 = vmatprep.subr.bf16.mxu0 %v3030_v0  ;;  %v271_v20 = vmul.f32 %v2333_v18, %v2331_v17  ;;  %v2336_v21 = vsel %vm275_vm3, 1.0, %v3030_v0  ;;  %vm285_vm6 = vcmp.ne.s32.totalorder %v3161_v13, %v284_v19  ;;  %vm276_vm7 = vcmp.ne.s32.totalorder %v3166_v15, %v274_v16  ;;  %554 = vmatprep.subr.bf16.mxu1 %v2717_v50  ;;  %v2729_v3 = vld [vmem:[%s3536_s2 + $0x158] ss:$28 sps:$4 sm:$0xff]  }
  0x45   : > { %v294_v24 = vstv %s2341_s19  ;;  %v272_v26 = vmul.f32 %v2334_v23, %v2332_v22  ;;  %v2339_v27 = vsel %vm285_vm6, 1.0, %v3030_v0  ;;  %v2337_v28 = vsel %vm276_vm7, 1.0, %v3030_v0  ;;  %v458_v23 = vld [vmem:[%s3539_s5 + $0x1] sm:$0x3]  ;;  %v2749_v50 = vld [vmem:[%s3536_s2 + $0xb8] ss:$28 sps:$4 sm:$0xff]  }
  0x46   : > { %v281_v25 = vmul.f32 %v2336_v21, %v271_v20  ;;  %vm295_vm8 = vcmp.ne.s32.totalorder %v3161_v13, %v294_v24  ;;  %vm286_vm9 = vcmp.ne.s32.totalorder %v3166_v15, %v284_v19  ;;  %vm296_vm10 = vcmp.ne.s32.totalorder %v3166_v15, %v294_v24 }
  0x47   : > { %2577 = vmatpush3.bf16.msra.mxu0 %v2706_v4  ;;  %v282_v30 = vmul.f32 %v2337_v28, %v272_v26  ;;  %v2342_v31 = vsel %vm295_vm8, 1.0, %v3030_v0  ;;  %v2340_v32 = vsel %vm286_vm9, 1.0, %v3030_v0  ;;  %v2343_v37 = vsel %vm296_vm10, 1.0, %v3030_v0  ;;  %555 = vmatpush1.bf16.msra.mxu1 %v2719_v59  ;;  %v2761_v59 = vld [vmem:[%s3536_s2 + $0x160] ss:$28 sps:$4 sm:$0xff]  }
  0x48   : > { %2578 = vmatprep.subr.bf16.mxu0 %v3030_v0  ;;  %v291_v29 = vmul.f32 %v2339_v27, %v281_v25  ;;  %556 = vmatprep.subr.bf16.mxu1 %v2720_v60  ;;  %v3032_v4 = vmov 0   ;;  %v3249_v22 = vsub.s32 0, %v3161_v13  ;;  %v2759_v60 = vld [vmem:[%s3536_s2 + $0x15c] ss:$28 sps:$4 sm:$0xff]  }
  0x49   : > { %v292_v35 = vmul.f32 %v2340_v32, %v282_v30  ;;  %582 = vmatprep.mubr.bf16.mxu1 %v3032_v4  ;;  %2702 = vset.pattern.permute.xlu1 %v3032_v4  ;;  %v2737_v32 = vld [vmem:[%s3536_s2 + $0x10] ss:$28 sps:$4 sm:$0xff]  }
  0x4a   : > { %v301_v34 = vmul.f32 %v2342_v31, %v291_v29  ;;  %2701 = vset.pattern.permute.xlu0 %v3032_v4  ;;  %v463_v24 = vrot.slane %v458_v23, %v3249_v22  ;;  %v2735_v31 = vld [vmem:[%s3536_s2 + $0xc] ss:$28 sps:$4 sm:$0xff]  }
  0x4b   : > { %2579 = vmatpush3.bf16.msra.mxu0 %v2707_v5  ;;  %v302_v42 = vmul.f32 %v2343_v37, %v292_v35  ;;  %557 = vmatpush1.bf16.msra.mxu1 %v2722_v61  ;;  %v2731_v5 = vld [vmem:[%s3536_s2 + $0x154] ss:$28 sps:$4 sm:$0xff]   ;;  %v2742_v35 = vld [vmem:[%s3536_s2 + $0x4c] ss:$28 sps:$4 sm:$0xff]   ;;  %v2745_v37 = vld [vmem:[%s3536_s2 + $0x80] ss:$28 sps:$4 sm:$0xff]  }
  0x4c   : > { %2580 = vmatprep.subr.bf16.mxu0 %v3030_v0  ;;  %558 = vmatprep.subr.bf16.mxu1 %v2723_v62  ;;  %v2762_v61 = vld [vmem:[%s3536_s2 + $0x164] ss:$28 sps:$4 sm:$0xff]   ;;  %v2765_v62 = vld [vmem:[%s3536_s2 + $0x198] ss:$28 sps:$4 sm:$0xff]   ;;  %v2773_v23 = vld [vmem:[#allocation4 + $0x30] ss:$24 sps:$4 sm:$0xff]  }
  0x4f   : > { %2581 = vmatpush3.bf16.msra.mxu0 %v2708_v6  ;;  %559 = vmatpush1.bf16.msra.mxu1 %v2725_v63  ;;  %v2732_v6 = vld [vmem:[%s3536_s2 + $0x190] ss:$28 sps:$4 sm:$0xff]  }
  0x50   : > { %2582 = vmatprep.subr.bf16.mxu0 %v3030_v0  ;;  %560 = vmatprep.subr.bf16.mxu1 %v2726_v1  ;;  %v2763_v63 = vld [vmem:[%s3536_s2 + $0x194] ss:$28 sps:$4 sm:$0xff]   ;;  %v2766_v1 = vld [vmem:[%s3536_s2 + $0x19c] ss:$28 sps:$4 sm:$0xff]  }
  0x53   : > { %2583 = vmatpush3.bf16.msra.mxu0 %v2709_v7  ;;  %561 = vmatpush1.bf16.msra.mxu1 %v2728_v2  ;;  %v2734_v7 = vld [vmem:[%s3536_s2 + $0x18c] ss:$28 sps:$4 sm:$0xff]   ;;  %v2769_v2 = vld [vmem:[#allocation4 + $0x4] ss:$24 sps:$4 sm:$0xff]  }
  0x54   : > { %2584 = vmatprep.subr.bf16.mxu0 %v3030_v0  ;;  %562 = vmatprep.subr.bf16.mxu1 %v2729_v3  ;;  %v2772_v3 = vld [vmem:[#allocation4 + $0xc] ss:$24 sps:$4 sm:$0xff]  }
  0x57   : > { %2585 = vmatpush3.bf16.msra.mxu0 %v2710_v8  ;;  %563 = vmatpush1.bf16.msra.mxu1 %v2731_v5 }
  0x58   : > { %564 = vmatprep.subr.bf16.mxu1 %v2732_v6  ;;  %807 = vmatprep.subr.bf16.mxu0 %v2737_v32  ;;  %v2782_v32 = vld [vmem:[#allocation4 + $0x68] ss:$24 sps:$4 sm:$0xff]  }
  0x5a   : > { %2587 = vmatmul.mubr.bf16.vlgmr.msra.gmra.mrb[0].mxu0 %v303_v11 }
  0x5b   : > { %839 = vmatprep.mubr.bf16.mxu0 %v3032_v4  ;;  %565 = vmatpush1.bf16.msra.mxu1 %v2734_v7 }
  0x5c   : > { %2590 = vmatprep.subr.bf16.mxu1 %v3030_v0  ;;  %808 = vmatpush1.bf16.msra.mxu0 %v2735_v31  ;;  %v2779_v31 = vld [vmem:[#allocation4 + $0x60] ss:$24 sps:$4 sm:$0xff]  }
 0x12d   : > { %v409_v36 = vpop.f32.mrb[0].mxu0 }
 0x12e   : > { %v410_v38 = vadd.f32 %v2344_v33, %v409_v36  ;;  %v2588_v39 = vpop.f32.mrb[1].mxu0  ;;  %v2739_v36 = vld [vmem:[%s3536_s2 + $0x44] ss:$28 sps:$4 sm:$0xff]  }
 0x12f   : > { %v412_v40 = vpop.f32.mrb[2].mxu0  ;;  %v2743_v39 = vld [vmem:[%s3536_s2 + $0x7c] ss:$28 sps:$4 sm:$0xff]  }
 0x130   : > { %v3189_v41 = vmul.f32 %v410_v38, %v301_v34  ;;  %v413_v43 = vadd.f32 %v2344_v33, %v412_v40  ;;  %v2589_v44 = vpop.f32.mrb[3].mxu0  ;;  %v2738_v33 = vld [vmem:[%s3536_s2 + $0x14] ss:$28 sps:$4 sm:$0xff]   ;;  %v2741_v34 = vld [vmem:[%s3536_s2 + $0x48] ss:$28 sps:$4 sm:$0xff]  }
 0x131   : > { %809 = vmatprep.subr.bf16.mxu0 %v2741_v34  ;;  %v2746_v38 = vld [vmem:[%s3536_s2 + $0x84] ss:$28 sps:$4 sm:$0xff]   ;;  %v2790_v34 = vld [vmem:[#allocation4 + $0x9c] ss:$24 sps:$4 sm:$0xff]  }
 0x132   : > { %418 = vadd.xlane.f32.xlu0 %v3189_v41  ;;  %v3192_v45 = vmul.f32 %v413_v43, %v302_v42  ;;  %810 = vmatpush1.bf16.msra.mxu0 %v2739_v36  ;;  %v2788_v36 = vld [vmem:[#allocation4 + $0x98] ss:$24 sps:$4 sm:$0xff]  }
 0x133   : > { %811 = vmatprep.subr.bf16.mxu0 %v2745_v37  ;;  %v2793_v37 = vld [vmem:[#allocation4 + $0xc4] ss:$24 sps:$4 sm:$0xff]  }
 0x136   : > { %420 = vadd.xlane.f32.xlu0 %v3192_v45  ;;  %812 = vmatpush1.bf16.msra.mxu0 %v2743_v39  ;;  %v2791_v39 = vld [vmem:[#allocation4 + $0xc0] ss:$24 sps:$4 sm:$0xff]  }
 0x137   : > { %813 = vmatprep.subr.bf16.mxu0 %v2749_v50  ;;  %v2806_v50 = vld [vmem:[#allocation4 + $0x128] ss:$24 sps:$4 sm:$0xff]  }
 0x1bf   : > { %v419_v51 = vpop.xlane.xlu0 %418 }
 0x1c0   : > { %v423_v52 = vmul.f32 0.0078125, %v419_v51  ;;  %v2747_v51 = vld [vmem:[%s3536_s2 + $0xb4] ss:$28 sps:$4 sm:$0xff]  }
 0x1c1   : > { %814 = vmatpush1.bf16.msra.mxu0 %v2747_v51  ;;  %v2811_v51 = vld [vmem:[#allocation4 + $0x154] ss:$24 sps:$4 sm:$0xff]  }
 0x1c2   : > { %v425_v53 = vsub.f32 %v3189_v41, %v423_v52  ;;  %v2750_v52 = vld [vmem:[%s3536_s2 + $0xbc] ss:$28 sps:$4 sm:$0xff]  }
 0x1c3   : > { %v421_v54 = vpop.xlane.xlu0 %420 }
 0x1c4   : > { %v424_v55 = vmul.f32 0.0078125, %v421_v54  ;;  %v427_v56 = vmul.f32 %v425_v53, %v425_v53  ;;  %v2751_v54 = vld [vmem:[%s3536_s2 + $0xec] ss:$28 sps:$4 sm:$0xff]  }
 0x1c6   : > { %v426_v57 = vsub.f32 %v3192_v45, %v424_v55  ;;  %429 = vadd.xlane.f32.xlu1 %v427_v56  ;;  %v2754_v55 = vld [vmem:[%s3536_s2 + $0xf4] ss:$28 sps:$4 sm:$0xff]   ;;  %v2755_v56 = vld [vmem:[%s3536_s2 + $0x124] ss:$28 sps:$4 sm:$0xff]  }
 0x1c8   : > { %v428_v58 = vmul.f32 %v426_v57, %v426_v57 }
 0x1ca   : > { %431 = vadd.xlane.f32.xlu1 %v428_v58  ;;  %v2758_v58 = vld [vmem:[%s3536_s2 + $0x12c] ss:$28 sps:$4 sm:$0xff]  }
 0x253   : > { %v430_v8 = vpop.xlane.xlu1 %429 }
 0x254   : > { %v433_v9 = vmul.f32 0.0078125, %v430_v8 }
 0x256   : > { %v435_v10 = vadd.f32 1e-05, %v433_v9 }
 0x257   : > { %v432_v11 = vpop.xlane.xlu1 %431 }
 0x258   : > { %v434_v14 = vmul.f32 0.0078125, %v432_v11  ;;  %2923 = vrsqrt.f32 %v435_v10 }
 0x25a   : > { %v436_v16 = vadd.f32 1e-05, %v434_v14 }
 0x25c   : > { %2925 = vrsqrt.f32 %v436_v16 }
 0x262   : > { %v2924_v17 = vpop.eup %2923 }
 0x263   : > { %v439_v19 = vmul.f32 %v2924_v17, %v425_v53  ;;  %v2753_v53 = vld [vmem:[%s3536_s2 + $0xf0] ss:$28 sps:$4 sm:$0xff]   ;;  %v2767_v17 = vld [vmem:[#allocation4] ss:$24 sps:$4 sm:$0xff]  }
 0x264   : > { %815 = vmatprep.subr.bf16.mxu0 %v2753_v53  ;;  %v2809_v53 = vld [vmem:[#allocation4 + $0x150] ss:$24 sps:$4 sm:$0xff]  }
 0x265   : > { %816 = vmatpush1.bf16.msra.mxu0 %v2751_v54  ;;  %v2812_v54 = vld [vmem:[#allocation4 + $0x158] ss:$24 sps:$4 sm:$0xff]  }
 0x266   : > { %v2926_v18 = vpop.eup %2925 }
 0x267   : > { %v440_v20 = vmul.f32 %v2926_v18, %v426_v57  ;;  %v2757_v57 = vld [vmem:[%s3536_s2 + $0x128] ss:$28 sps:$4 sm:$0xff]  }
 0x268   : > { %817 = vmatprep.subr.bf16.mxu0 %v2757_v57  ;;  %v2770_v18 = vld [vmem:[#allocation4 + $0x8] ss:$24 sps:$4 sm:$0xff]  }
 0x269   : > { %v441_v21 = vpack.c.bf16 %v440_v20, %v439_v19  ;;  %818 = vmatpush1.bf16.msra.mxu0 %v2755_v56  ;;  %v2775_v20 = vld [vmem:[#allocation4 + $0x34] ss:$24 sps:$4 sm:$0xff]   ;;  %v2815_v57 = vld [vmem:[#allocation4 + $0x180] ss:$24 sps:$4 sm:$0xff]  }
 0x26a   : > { %819 = vmatprep.subr.bf16.mxu0 %v2761_v59  ;;  %v2820_v56 = vld [vmem:[#allocation4 + $0x18c] ss:$24 sps:$4 sm:$0xff]  }
 0x26b   : > { %583 = vmatmul.mubr.bf16.vlgmr.msra.gmra.mrb[0].mxu1 %v441_v21  ;;  %v2778_v21 = vld [vmem:[#allocation4 + $0x3c] ss:$24 sps:$4 sm:$0xff]  }
 0x26c   : > { %2606 = vmatprep.mubr.msk.bf16.mxu1 %vm3031_vm0, %v3030_v0  ;;  %2591 = vmatpush3.bf16.msra.mxu1 %v2738_v33  ;;  %v2787_v33 = vld [vmem:[#allocation4 + $0x94] ss:$24 sps:$4 sm:$0xff]  }
 0x26d   : > { %2592 = vmatprep.subr.bf16.mxu1 %v3030_v0  ;;  %820 = vmatpush1.bf16.msra.mxu0 %v2759_v60  ;;  %v2823_v59 = vld [vmem:[#allocation4 + $0x1b4] ss:$24 sps:$4 sm:$0xff]  }
 0x26e   : > { %821 = vmatprep.subr.bf16.mxu0 %v2765_v62  ;;  %v2826_v60 = vld [vmem:[#allocation4 + $0x1bc] ss:$24 sps:$4 sm:$0xff]   ;;  %v2824_v62 = vld [vmem:[#allocation4 + $0x1b8] ss:$24 sps:$4 sm:$0xff]  }
 0x270   : > { %2593 = vmatpush3.bf16.msra.mxu1 %v2742_v35  ;;  %v2785_v35 = vld [vmem:[#allocation4 + $0x90] ss:$24 sps:$4 sm:$0xff]  }
 0x271   : > { %2594 = vmatprep.subr.bf16.mxu1 %v3030_v0  ;;  %822 = vmatpush1.bf16.msra.mxu0 %v2763_v63  ;;  %v2829_v63 = vld [vmem:[#allocation4 + $0x1e4] ss:$24 sps:$4 sm:$0xff]  }
 0x272   : > { %1501 = vmatprep.subr.bf16.mxu0 %v2769_v2  ;;  %v2827_v2 = vld [vmem:[#allocation4 + $0x1e0] ss:$24 sps:$4 sm:$0xff]  }
 0x274   : > { %2595 = vmatpush3.bf16.msra.mxu1 %v2746_v38  ;;  %v2796_v38 = vld [vmem:[#allocation4 + $0xcc] ss:$24 sps:$4 sm:$0xff]  }
 0x275   : > { %2596 = vmatprep.subr.bf16.mxu1 %v3030_v0 }
 0x278   : > { %2597 = vmatpush3.bf16.msra.mxu1 %v2750_v52  ;;  %v2814_v52 = vld [vmem:[#allocation4 + $0x15c] ss:$24 sps:$4 sm:$0xff]  }
 0x279   : > { %2598 = vmatprep.subr.bf16.mxu1 %v3030_v0 }
 0x27c   : > { %2599 = vmatpush3.bf16.msra.mxu1 %v2754_v55  ;;  %v2817_v55 = vld [vmem:[#allocation4 + $0x184] ss:$24 sps:$4 sm:$0xff]  }
 0x27d   : > { %2600 = vmatprep.subr.bf16.mxu1 %v3030_v0 }
 0x280   : > { %2601 = vmatpush3.bf16.msra.mxu1 %v2758_v58  ;;  %v2818_v58 = vld [vmem:[#allocation4 + $0x188] ss:$24 sps:$4 sm:$0xff]  }
 0x281   : > { %2602 = vmatprep.subr.bf16.mxu1 %v3030_v0 }
 0x284   : > { %2603 = vmatpush3.bf16.msra.mxu1 %v2762_v61  ;;  %v2821_v61 = vld [vmem:[#allocation4 + $0x1b0] ss:$24 sps:$4 sm:$0xff]  }
 0x285   : > { %2604 = vmatprep.subr.bf16.mxu1 %v3030_v0 }
 0x288   : > { %2605 = vmatpush3.bf16.msra.mxu1 %v2766_v1  ;;  %v2832_v1 = vld [vmem:[#allocation4 + $0x1ec] ss:$24 sps:$4 sm:$0xff]  }
 0x289   : > { %1544 = vmatprep.subr.bf16.mxu1 %v2772_v3  ;;  %v2830_v3 = vld [vmem:[#allocation4 + $0x1e8] ss:$24 sps:$4 sm:$0xff]  }
 0x33e   : > { %v584_v25 = vpop.f32.mrb[0].mxu1 }
 0x33f   : > { %v3255_v26 = vadd.f32 %v584_v25, %v463_v24  ;;  %v3257_v27 = vpop.f32.mrb[1].mxu1  ;;  %v2781_v25 = vld [vmem:[#allocation4 + $0x64] ss:$24 sps:$4 sm:$0xff]  }
 0x340   : > { %v588_v28 = vpop.f32.mrb[2].mxu1 }
 0x341   : > { %v3259_v29 = vadd.f32 %v588_v28, %v463_v24  ;;  %v3261_v30 = vpop.f32.mrb[3].mxu1  ;;  %607 = vadd.xlane.f32.xlu0 %v3255_v26  ;;  %v2776_v24 = vld [vmem:[#allocation4 + $0x38] ss:$24 sps:$4 sm:$0xff]   ;;  %v2784_v28 = vld [vmem:[#allocation4 + $0x6c] ss:$24 sps:$4 sm:$0xff]  }
 0x343   : > { %609 = vadd.xlane.f32.xlu1 %v3259_v29 }
 0x3ce   : > { %v608_v40 = vpop.xlane.xlu0 %607 }
 0x3cf   : > { %v611_v42 = vmul.f32 0.0078125, %v608_v40  ;;  %v2794_v40 = vld [vmem:[#allocation4 + $0xc8] ss:$24 sps:$4 sm:$0xff]  }
 0x3d0   : > { %v610_v43 = vpop.xlane.xlu1 %609 }
 0x3d1   : > { %v613_v44 = vsub.f32 %v3255_v26, %v611_v42  ;;  %v612_v46 = vmul.f32 0.0078125, %v610_v43  ;;  %v2799_v42 = vld [vmem:[#allocation4 + $0xf4] ss:$24 sps:$4 sm:$0xff]  }
 0x3d2   : > { %v2802_v43 = vld [vmem:[#allocation4 + $0xfc] ss:$24 sps:$4 sm:$0xff]  }
 0x3d3   : > { %v614_v47 = vsub.f32 %v3259_v29, %v612_v46  ;;  %v615_v48 = vmul.f32 %v613_v44, %v613_v44  ;;  %v2800_v46 = vld [vmem:[#allocation4 + $0xf8] ss:$24 sps:$4 sm:$0xff]  }
 0x3d5   : > { %617 = vadd.xlane.f32.xlu0 %v615_v48  ;;  %v616_v49 = vmul.f32 %v614_v47, %v614_v47  ;;  %v2808_v48 = vld [vmem:[#allocation4 + $0x12c] ss:$24 sps:$4 sm:$0xff]  }
 0x3d7   : > { %619 = vadd.xlane.f32.xlu1 %v616_v49  ;;  %v2803_v49 = vld [vmem:[#allocation4 + $0x120] ss:$24 sps:$4 sm:$0xff]  }
 0x462   : > { %v618_v4 = vpop.xlane.xlu0 %617 }
 0x463   : > { %v621_v5 = vmul.f32 0.0078125, %v618_v4  ;;  %v2835_v4 = vld [vmem:[#allocation4 + $0x214] ss:$24 sps:$4 sm:$0xff]  }
 0x464   : > { %v620_v6 = vpop.xlane.xlu1 %619 }
 0x465   : > { %v623_v7 = vadd.f32 1e-05, %v621_v5  ;;  %v622_v8 = vmul.f32 0.0078125, %v620_v6  ;;  %v2838_v5 = vld [vmem:[#allocation4 + $0x21c] ss:$24 sps:$4 sm:$0xff]  }
 0x466   : > { %v2833_v6 = vld [vmem:[#allocation4 + $0x210] ss:$24 sps:$4 sm:$0xff]  }
 0x467   : > { %2927 = vrsqrt.f32 %v623_v7  ;;  %v624_v9 = vadd.f32 1e-05, %v622_v8  ;;  %v2836_v7 = vld [vmem:[#allocation4 + $0x218] ss:$24 sps:$4 sm:$0xff]   ;;  %v2841_v8 = vld [vmem:[#allocation4 + $0x244] ss:$24 sps:$4 sm:$0xff]  }
 0x469   : > { %2929 = vrsqrt.f32 %v624_v9  ;;  %v2844_v9 = vld [vmem:[#allocation4 + $0x24c] ss:$24 sps:$4 sm:$0xff]  }
 0x471   : > { %v2928_v10 = vpop.eup %2927 }
 0x472   : > { %v627_v14 = vmul.f32 %v2928_v10, %v613_v44  ;;  %v2797_v44 = vld [vmem:[#allocation4 + $0xf0] ss:$24 sps:$4 sm:$0xff]   ;;  %v2839_v10 = vld [vmem:[#allocation4 + $0x240] ss:$24 sps:$4 sm:$0xff]  }
 0x473   : > { %v2930_v11 = vpop.eup %2929 }
 0x474   : > { %v628_v16 = vmul.f32 %v2930_v11, %v614_v47  ;;  %v2805_v47 = vld [vmem:[#allocation4 + $0x124] ss:$24 sps:$4 sm:$0xff]   ;;  %v2842_v11 = vld [vmem:[#allocation4 + $0x248] ss:$24 sps:$4 sm:$0xff]  }
 0x476   : > { %v629_v19 = vpack.c.bf16 %v628_v16, %v627_v14  ;;  %v2847_v14 = vld [vmem:[#allocation4 + $0x274] ss:$24 sps:$4 sm:$0xff]  }
 0x477   : > { %v2850_v16 = vld [vmem:[#allocation4 + $0x27c] ss:$24 sps:$4 sm:$0xff]  }
 0x478   : > { %840 = vmatmul.mubr.bf16.vlgmr.msra.gmra.mrb[4].mxu0 %v629_v19  ;;  %2607 = vmatmul.mubr.bf16.vlgmr.msra.gmra.mrb[4].mxu1 %v629_v19  ;;  %v2853_v19 = vld [vmem:[#allocation4 + $0x2a4] ss:$24 sps:$4 sm:$0xff]  }
 0x479   : > { %1502 = vmatpush1.bf16.msra.mxu0 %v2767_v17  ;;  %1545 = vmatpush1.bf16.msra.mxu1 %v2770_v18  ;;  %v2845_v17 = vld [vmem:[#allocation4 + $0x270] ss:$24 sps:$4 sm:$0xff]  }
 0x47a   : > { %1503 = vmatprep.subr.bf16.mxu0 %v2775_v20  ;;  %1546 = vmatprep.subr.bf16.mxu1 %v2778_v21  ;;  %v2848_v18 = vld [vmem:[#allocation4 + $0x278] ss:$24 sps:$4 sm:$0xff]   ;;  %v2856_v21 = vld [vmem:[#allocation4 + $0x2ac] ss:$24 sps:$4 sm:$0xff]  }
 0x47b   : > { %v2851_v20 = vld [vmem:[#allocation4 + $0x2a0] ss:$24 sps:$4 sm:$0xff]  }
 0x47d   : > { %1504 = vmatpush1.bf16.msra.mxu0 %v2773_v23  ;;  %1547 = vmatpush1.bf16.msra.mxu1 %v2776_v24  ;;  %v2854_v23 = vld [vmem:[#allocation4 + $0x2a8] ss:$24 sps:$4 sm:$0xff]   ;;  %v2859_v24 = vld [vmem:[#allocation4 + $0x2d4] ss:$24 sps:$4 sm:$0xff]  }
 0x47e   : > { %1505 = vmatprep.subr.bf16.mxu0 %v2781_v25  ;;  %1548 = vmatprep.subr.bf16.mxu1 %v2784_v28  ;;  %v2857_v25 = vld [vmem:[#allocation4 + $0x2d0] ss:$24 sps:$4 sm:$0xff]   ;;  %v2862_v28 = vld [vmem:[#allocation4 + $0x2dc] ss:$24 sps:$4 sm:$0xff]  }
 0x481   : > { %1506 = vmatpush1.bf16.msra.mxu0 %v2779_v31  ;;  %1549 = vmatpush1.bf16.msra.mxu1 %v2782_v32  ;;  %v2860_v31 = vld [vmem:[#allocation4 + $0x2d8] ss:$24 sps:$4 sm:$0xff]   ;;  %v2865_v32 = vld [vmem:[#allocation4 + $0x14] ss:$24 sps:$4 sm:$0xff]  }
 0x482   : > { %1507 = vmatprep.subr.bf16.mxu0 %v2787_v33  ;;  %1550 = vmatprep.subr.bf16.mxu1 %v2790_v34  ;;  %v3349_v33 = vld [vmem:[%s3539_s5 + $0x3] sm:$0x7]  ;;  %v3352_v34 = vsub.s32 1, %v3161_v13 }
 0x485   : > { %1508 = vmatpush1.bf16.msra.mxu0 %v2785_v35  ;;  %1551 = vmatpush1.bf16.msra.mxu1 %v2788_v36  ;;  %v667_v35 = vrot.slane %v3349_v33, %v3249_v22 }
 0x486   : > { %1509 = vmatprep.subr.bf16.mxu0 %v2793_v37  ;;  %1552 = vmatprep.subr.bf16.mxu1 %v2796_v38  ;;  %v671_v38 = vrot.slane %v3349_v33, %v3352_v34 }
 0x489   : > { %1510 = vmatpush1.bf16.msra.mxu0 %v2791_v39  ;;  %1553 = vmatpush1.bf16.msra.mxu1 %v2794_v40 }
 0x48a   : > { %1511 = vmatprep.subr.bf16.mxu0 %v2799_v42  ;;  %1554 = vmatprep.subr.bf16.mxu1 %v2802_v43 }
 0x48d   : > { %1512 = vmatpush1.bf16.msra.mxu0 %v2797_v44  ;;  %1555 = vmatpush1.bf16.msra.mxu1 %v2800_v46 }
 0x48e   : > { %1513 = vmatprep.subr.bf16.mxu0 %v2805_v47  ;;  %1556 = vmatprep.subr.bf16.mxu1 %v2808_v48 }
 0x491   : > { %1514 = vmatpush1.bf16.msra.mxu0 %v2803_v49  ;;  %1557 = vmatpush1.bf16.msra.mxu1 %v2806_v50 }
 0x492   : > { %1515 = vmatprep.subr.bf16.mxu0 %v2811_v51  ;;  %1558 = vmatprep.subr.bf16.mxu1 %v2814_v52 }
 0x495   : > { %1516 = vmatpush1.bf16.msra.mxu0 %v2809_v53  ;;  %1559 = vmatpush1.bf16.msra.mxu1 %v2812_v54  ;;  %v2863_v53 = vld [vmem:[#allocation4 + $0x10] ss:$24 sps:$4 sm:$0xff]   ;;  %v2868_v54 = vld [vmem:[#allocation4 + $0x44] ss:$24 sps:$4 sm:$0xff]  }
 0x496   : > { %1517 = vmatprep.subr.bf16.mxu0 %v2817_v55  ;;  %1560 = vmatprep.subr.bf16.mxu1 %v2820_v56  ;;  %v2866_v55 = vld [vmem:[#allocation4 + $0x40] ss:$24 sps:$4 sm:$0xff]   ;;  %v2871_v56 = vld [vmem:[#allocation4 + $0x74] ss:$24 sps:$4 sm:$0xff]  }
 0x499   : > { %1518 = vmatpush1.bf16.msra.mxu0 %v2815_v57  ;;  %1561 = vmatpush1.bf16.msra.mxu1 %v2818_v58  ;;  %v2869_v57 = vld [vmem:[#allocation4 + $0x70] ss:$24 sps:$4 sm:$0xff]   ;;  %v2874_v58 = vld [vmem:[#allocation4 + $0xa4] ss:$24 sps:$4 sm:$0xff]  }
 0x49a   : > { %1519 = vmatprep.subr.bf16.mxu0 %v2823_v59  ;;  %1562 = vmatprep.subr.bf16.mxu1 %v2826_v60  ;;  %v2872_v59 = vld [vmem:[#allocation4 + $0xa0] ss:$24 sps:$4 sm:$0xff]   ;;  %v2877_v60 = vld [vmem:[#allocation4 + $0xd4] ss:$24 sps:$4 sm:$0xff]  }
 0x49d   : > { %1520 = vmatpush1.bf16.msra.mxu0 %v2821_v61  ;;  %1563 = vmatpush1.bf16.msra.mxu1 %v2824_v62  ;;  %v2875_v61 = vld [vmem:[#allocation4 + $0xd0] ss:$24 sps:$4 sm:$0xff]   ;;  %v2880_v62 = vld [vmem:[#allocation4 + $0x104] ss:$24 sps:$4 sm:$0xff]  }
 0x49e   : > { %1521 = vmatprep.subr.bf16.mxu0 %v2829_v63  ;;  %1564 = vmatprep.subr.bf16.mxu1 %v2832_v1  ;;  %v2878_v63 = vld [vmem:[#allocation4 + $0x100] ss:$24 sps:$4 sm:$0xff]   ;;  %v2883_v1 = vld [vmem:[#allocation4 + $0x134] ss:$24 sps:$4 sm:$0xff]  }
 0x4a1   : > { %1522 = vmatpush1.bf16.msra.mxu0 %v2827_v2  ;;  %1565 = vmatpush1.bf16.msra.mxu1 %v2830_v3  ;;  %v2881_v2 = vld [vmem:[#allocation4 + $0x130] ss:$24 sps:$4 sm:$0xff]   ;;  %v2886_v3 = vld [vmem:[#allocation4 + $0x164] ss:$24 sps:$4 sm:$0xff]  }
 0x4a2   : > { %1523 = vmatprep.subr.bf16.mxu0 %v2835_v4  ;;  %1566 = vmatprep.subr.bf16.mxu1 %v2838_v5  ;;  %v2884_v4 = vld [vmem:[#allocation4 + $0x160] ss:$24 sps:$4 sm:$0xff]   ;;  %v2889_v5 = vld [vmem:[#allocation4 + $0x194] ss:$24 sps:$4 sm:$0xff]  }
 0x4a5   : > { %1524 = vmatpush1.bf16.msra.mxu0 %v2833_v6  ;;  %1567 = vmatpush1.bf16.msra.mxu1 %v2836_v7  ;;  %v2887_v6 = vld [vmem:[#allocation4 + $0x190] ss:$24 sps:$4 sm:$0xff]   ;;  %v2892_v7 = vld [vmem:[#allocation4 + $0x1c4] ss:$24 sps:$4 sm:$0xff]  }
 0x4a6   : > { %1525 = vmatprep.subr.bf16.mxu0 %v2841_v8  ;;  %1568 = vmatprep.subr.bf16.mxu1 %v2844_v9  ;;  %v2890_v8 = vld [vmem:[#allocation4 + $0x1c0] ss:$24 sps:$4 sm:$0xff]   ;;  %v2895_v9 = vld [vmem:[#allocation4 + $0x1f4] ss:$24 sps:$4 sm:$0xff]  }
 0x4a9   : > { %1526 = vmatpush1.bf16.msra.mxu0 %v2839_v10  ;;  %1569 = vmatpush1.bf16.msra.mxu1 %v2842_v11  ;;  %v2893_v10 = vld [vmem:[#allocation4 + $0x1f0] ss:$24 sps:$4 sm:$0xff]   ;;  %v2898_v11 = vld [vmem:[#allocation4 + $0x224] ss:$24 sps:$4 sm:$0xff]  }
 0x4aa   : > { %1527 = vmatprep.subr.bf16.mxu0 %v2847_v14  ;;  %1570 = vmatprep.subr.bf16.mxu1 %v2850_v16  ;;  %v2896_v14 = vld [vmem:[#allocation4 + $0x220] ss:$24 sps:$4 sm:$0xff]   ;;  %v2901_v16 = vld [vmem:[#allocation4 + $0x254] ss:$24 sps:$4 sm:$0xff]  }
 0x4ad   : > { %1528 = vmatpush1.bf16.msra.mxu0 %v2845_v17  ;;  %1571 = vmatpush1.bf16.msra.mxu1 %v2848_v18  ;;  %v2899_v17 = vld [vmem:[#allocation4 + $0x250] ss:$24 sps:$4 sm:$0xff]   ;;  %v2904_v18 = vld [vmem:[#allocation4 + $0x284] ss:$24 sps:$4 sm:$0xff]  }
 0x4ae   : > { %1529 = vmatprep.subr.bf16.mxu0 %v2853_v19  ;;  %1572 = vmatprep.subr.bf16.mxu1 %v2856_v21  ;;  %v2902_v19 = vld [vmem:[#allocation4 + $0x280] ss:$24 sps:$4 sm:$0xff]   ;;  %v2905_v21 = vld [vmem:[#allocation4 + $0x2b0] ss:$24 sps:$4 sm:$0xff]  }
 0x4b1   : > { %1530 = vmatpush1.bf16.msra.mxu0 %v2851_v20  ;;  %1573 = vmatpush1.bf16.msra.mxu1 %v2854_v23  ;;  %v2907_v20 = vld [vmem:[#allocation4 + $0x2b4] ss:$24 sps:$4 sm:$0xff]   ;;  %v2910_v23 = vld [vmem:[#allocation4 + $0x2e4] ss:$24 sps:$4 sm:$0xff]  }
 0x4b2   : > { %1531 = vmatprep.subr.bf16.mxu0 %v2859_v24  ;;  %1574 = vmatprep.subr.bf16.mxu1 %v2862_v28  ;;  %v2908_v24 = vld [vmem:[#allocation4 + $0x2e0] ss:$24 sps:$4 sm:$0xff]  }
 0x4b5   : > { %1532 = vmatpush1.bf16.msra.mxu0 %v2857_v25  ;;  %1575 = vmatpush1.bf16.msra.mxu1 %v2860_v31  ;;  %v3368_v25 = vand.u32 127, %v250_v12  ;;  %v3381_v31 = vld [vmem:[%s3539_s5 + $0x7] sm:$0x3f]  ;;  %v674_v12 = vsub.s32 2, %v3161_v13 }
 0x4b6   : > { %1587 = vmatprep.subr.bf16.mxu0 %v2865_v32  ;;  %v998_v32 = vrot.slane %v3381_v31, %v3352_v34 }
 0x4b7   : > { %vm1646_vm12 = vcmp.ge.s32.totalorder %v3161_v13, %v3368_v25  ;;  %vm1647_vm13 = vcmp.ge.s32.totalorder %v3166_v15, %v3368_v25  ;;  %vm1670_vm15 = vcmp.eq.s32.totalorder %v3161_v13, %v3368_v25  ;;  %vm1652_vm1 = vcmp.gt.s32.totalorder %v3161_v13, %v3368_v25 }
 0x4b8   : > { %v2493_v28 = vsel %vm1646_vm12, 1.0, %v3030_v0  ;;  %vm1653_vm2 = vcmp.gt.s32.totalorder %v3166_v15, %v3368_v25  ;;  %vm1671_vm3 = vcmp.eq.s32.totalorder %v3166_v15, %v3368_v25 }
 0x54b   : > { %v841_v36 = vpop.f32.mrb[4].mxu0  ;;  %v3356_v37 = vpop.f32.mrb[4].mxu1 }
 0x54c   : > { %v843_v39 = vpop.f32.mrb[5].mxu0  ;;  %v2608_v40 = vpop.f32.mrb[5].mxu1  ;;  %v842_v44 = vadd.f32 %v841_v36, %v667_v35  ;;  %v1002_v36 = vrot.slane %v3381_v31, %v674_v12 }
 0x54d   : > { %v845_v42 = vpop.f32.mrb[6].mxu0  ;;  %v3360_v43 = vpop.f32.mrb[6].mxu1  ;;  %v844_v49 = vadd.f32 %v843_v39, %v671_v38 }
 0x54e   : > { %v846_v46 = vadd.f32 %v845_v42, %v667_v35  ;;  %v847_v47 = vpop.f32.mrb[7].mxu0  ;;  %v2609_v48 = vpop.f32.mrb[7].mxu1  ;;  %v994_v35 = vrot.slane %v3381_v31, %v3249_v22 }
 0x54f   : > { %v848_v50 = vadd.f32 %v847_v47, %v671_v38 }
 0x550   : > { %v3362_v51 = vpack.c.bf16 %v846_v46, %v842_v44 }
 0x551   : > { %v892_v52 = vpack.c.bf16 %v848_v50, %v844_v49 }
 0x553   : > { %1533 = vmatprep.mubr.bf16.mxu0 %v892_v52  ;;  %1576 = vmatprep.mubr.bf16.mxu1 %v892_v52 }
 0x554   : > { %1534 = vmatmul.mubr.bf16.vlgmr.msra.gmra.mrb[8].mxu0 %v3362_v51  ;;  %1577 = vmatmul.mubr.bf16.vlgmr.msra.gmra.mrb[8].mxu1 %v3362_v51 }
 0x555   : > { %1588 = vmatpush1.bf16.msra.mxu0 %v2863_v53  ;;  %1619 = vmatprep.mubr.bf16.mxu0 %v892_v52 }
 0x556   : > { %1589 = vmatprep.subr.bf16.mxu0 %v2868_v54  ;;  %2621 = vmatprep.mubr.msk.f32.mxu1 %vm1690_vm11, %v2493_v28 }
 0x559   : > { %1590 = vmatpush1.bf16.msra.mxu0 %v2866_v55 }
 0x55a   : > { %1591 = vmatprep.subr.bf16.mxu0 %v2871_v56 }
 0x55d   : > { %1592 = vmatpush1.bf16.msra.mxu0 %v2869_v57 }
 0x55e   : > { %1593 = vmatprep.subr.bf16.mxu0 %v2874_v58 }
 0x561   : > { %1594 = vmatpush1.bf16.msra.mxu0 %v2872_v59  ;;  %v1009_v59 = vsub.s32 4, %v3161_v13 }
 0x562   : > { %1595 = vmatprep.subr.bf16.mxu0 %v2877_v60  ;;  %v1013_v60 = vsub.s32 5, %v3161_v13 }
 0x565   : > { %1596 = vmatpush1.bf16.msra.mxu0 %v2875_v61  ;;  %v1010_v61 = vrot.slane %v3381_v31, %v1009_v59 }
 0x566   : > { %1597 = vmatprep.subr.bf16.mxu0 %v2880_v62  ;;  %v1014_v62 = vrot.slane %v3381_v31, %v1013_v60 }
 0x569   : > { %1598 = vmatpush1.bf16.msra.mxu0 %v2878_v63 }
 0x56a   : > { %1599 = vmatprep.subr.bf16.mxu0 %v2883_v1 }
 0x56d   : > { %1600 = vmatpush1.bf16.msra.mxu0 %v2881_v2 }
 0x56e   : > { %1601 = vmatprep.subr.bf16.mxu0 %v2886_v3 }
 0x571   : > { %1602 = vmatpush1.bf16.msra.mxu0 %v2884_v4 }
 0x572   : > { %1603 = vmatprep.subr.bf16.mxu0 %v2889_v5 }
 0x575   : > { %1604 = vmatpush1.bf16.msra.mxu0 %v2887_v6 }
 0x576   : > { %1605 = vmatprep.subr.bf16.mxu0 %v2892_v7 }
 0x579   : > { %1606 = vmatpush1.bf16.msra.mxu0 %v2890_v8 }
 0x57a   : > { %1607 = vmatprep.subr.bf16.mxu0 %v2895_v9  ;;  %v2494_v9 = vsel %vm1647_vm13, 1.0, %v3030_v0 }
 0x57d   : > { %1608 = vmatpush1.bf16.msra.mxu0 %v2893_v10 }
 0x57e   : > { %1609 = vmatprep.subr.bf16.mxu0 %v2898_v11 }
 0x581   : > { %1610 = vmatpush1.bf16.msra.mxu0 %v2896_v14  ;;  %v2497_v14 = vsel %vm1670_vm15, 1.0, %v3030_v0 }
 0x582   : > { %1611 = vmatprep.subr.bf16.mxu0 %v2901_v16  ;;  %v2495_v16 = vsel %vm1652_vm1, 1.0, %v3030_v0 }
 0x585   : > { %1612 = vmatpush1.bf16.msra.mxu0 %v2899_v17 }
 0x586   : > { %1613 = vmatprep.subr.bf16.mxu0 %v2904_v18 }
 0x589   : > { %1614 = vmatpush1.bf16.msra.mxu0 %v2902_v19  ;;  %v2496_v19 = vsel %vm1653_vm2, 1.0, %v3030_v0 }
 0x58a   : > { %1615 = vmatprep.subr.bf16.mxu0 %v2907_v20  ;;  %v2498_v20 = vsel %vm1671_vm3, 1.0, %v3030_v0 }
 0x58d   : > { %1616 = vmatpush1.bf16.msra.mxu0 %v2905_v21 }
 0x58e   : > { %1617 = vmatprep.subr.bf16.mxu0 %v2910_v23 }
 0x591   : > { %1618 = vmatpush1.bf16.msra.mxu0 %v2908_v24 }
 0x594   : > { %1620 = vmatmul.mubr.bf16.vlgmr.msra.gmra.mrb[12].mxu0 %v3362_v51 }
 0x595   : > { %2614 = vmatprep.mubr.msk.f32.mxu0 %vm1690_vm11, %v2493_v28 }
 0x627   : > { %v1535_v38 = vpop.f32.mrb[8].mxu0  ;;  %v1578_v39 = vpop.f32.mrb[8].mxu1 }
 0x628   : > { %v1537_v40 = vpop.f32.mrb[9].mxu0  ;;  %v3391_v42 = vpop.f32.mrb[9].mxu1  ;;  %v1536_v48 = vadd.f32 %v1535_v38, %v994_v35  ;;  %v1579_v49 = vadd.f32 %v1578_v39, %v1002_v36 }
 0x629   : > { %v1538_v44 = vadd.f32 %v1537_v40, %v998_v32  ;;  %v1539_v46 = vpop.f32.mrb[10].mxu0  ;;  %v1582_v47 = vpop.f32.mrb[10].mxu1 }
 0x62a   : > { %v1540_v50 = vadd.f32 %v1539_v46, %v994_v35  ;;  %v1583_v51 = vadd.f32 %v1582_v47, %v1002_v36  ;;  %v1541_v52 = vpop.f32.mrb[11].mxu0  ;;  %v3393_v53 = vpop.f32.mrb[11].mxu1 }
 0x62b   : > { %v1542_v22 = vadd.f32 %v1541_v52, %v998_v32  ;;  %v1630_v56 = vmul.f32 0.125, %v1538_v44 }
 0x62c   : > { %v1875_v54 = vpack.c.bf16 %v1540_v50, %v1536_v48  ;;  %v1944_v55 = vpack.c.bf16 %v1583_v51, %v1579_v49 }
 0x62d   : > { %v1631_v57 = vmul.f32 0.125, %v1542_v22 }
 0x62f   : > { %v1876_v58 = vpack.c.bf16 %v1631_v57, %v1630_v56 }
 0x631   : > { %v1882_v10 = vsel %vm1877_vm14, %v1876_v58, 0 }
 0x667   : > { %v1621_v63 = vpop.f32.mrb[12].mxu0 }
 0x668   : > { %v1622_v1 = vadd.f32 %v1621_v63, %v1010_v61  ;;  %v1623_v2 = vpop.f32.mrb[13].mxu0 }
 0x669   : > { %v1624_v3 = vadd.f32 %v1623_v2, %v1014_v62  ;;  %v1625_v4 = vpop.f32.mrb[14].mxu0 }
 0x66a   : > { %v1627_v5 = vpop.f32.mrb[15].mxu0  ;;  %1678 = vperm.xlu1 %2702, %v1622_v1   ;;  %v1626_v8 = vadd.f32 %v1625_v4, %v1010_v61 }
 0x66b   : > { %v1628_v6 = vadd.f32 %v1627_v5, %v1014_v62  ;;  %1660 = vperm.xlu0 %2701, %v1624_v3  }
 0x66d   : > { %v2672_v7 = vpack.c.bf16 %v1628_v6, %v1624_v3 }
 0x66e   : > { %1665 = vperm.xlu1 %2702, %v1628_v6  }
 0x66f   : > { %2673 = vmatprep.subr.bf16.mxu1 %v2672_v7 }
 0x670   : > { %2675 = vmatpush3.bf16.msra.mxu1 %v2672_v7 }
 0x671   : > { %2624 = vmatprep.subr.bf16.mxu1 %v3030_v0 }
 0x672   : > { %1683 = vperm.xlu1 %2702, %v1626_v8  }
 0x673   : > { %2622 = vmatmul.mubr.msk.f32.vlgmr.msra.gmra.mrb[12].mxu1 %vm1690_vm11, %v2494_v9 }
 0x674   : > { %2626 = vmatprep.mubr.msk.bf16.mxu1 %vm3031_vm0, %v3030_v0 }
 0x679   : > { %2625 = vmatpush3.bf16.xpose.msra.mxu1 %v1882_v10 }
 0x67a   : > { %2630 = vmatprep.subr.bf16.mxu1 %v3030_v0 }
 0x680   : > { %2627 = vmatmul.mubr.msk.bf16.vlgmr.msra.gmra.mrb[16].mxu1 %vm1877_vm14, %v1875_v54 }
 0x681   : > { %2631 = vmatpush3.bf16.msra.mxu1 %v1944_v55  ;;  %2632 = vmatprep.mubr.msk.bf16.mxu1 %vm3031_vm0, %v3030_v0 }
 0x682   : > { %2636 = vmatprep.subr.bf16.mxu1 %v3030_v0 }
 0x6e9   : > { %v1679_v11 = vpop.permute.xlu1 %1678 }
 0x6ea   : > { %v1661_v17 = vpop.permute.xlu0 %1660  ;;  %v1686_v21 = vmul.f32 %v2497_v14, %v1679_v11 }
 0x6eb   : > { %v1668_v23 = vmul.f32 %v2495_v16, %v1661_v17 }
 0x6ed   : > { %v1666_v18 = vpop.permute.xlu1 %1665  ;;  %v1688_v35 = vadd.f32 %v1686_v21, %v1668_v23 }
 0x6ee   : > { %v1669_v28 = vmul.f32 %v2496_v19, %v1666_v18 }
 0x6f1   : > { %v1684_v24 = vpop.permute.xlu1 %1683 }
 0x6f2   : > { %v1687_v32 = vmul.f32 %v2498_v20, %v1684_v24 }
 0x6f4   : > { %v1689_v36 = vadd.f32 %v1687_v32, %v1669_v28  ;;  %v1005_v28 = vsub.s32 3, %v3161_v13 }
 0x6f6   : > { %v2668_v38 = vpack.c.bf16 %v1689_v36, %v1688_v35  ;;  %v1006_v32 = vrot.slane %v3381_v31, %v1005_v28 }
 0x6f8   : > { %2669 = vmatprep.subr.bf16.mxu0 %v2668_v38  ;;  %v1581_v35 = vadd.f32 %v3391_v42, %v1006_v32  ;;  %v1585_v36 = vadd.f32 %v3393_v53, %v1006_v32 }
 0x6f9   : > { %2671 = vmatpush3.bf16.msra.mxu0 %v2668_v38 }
 0x6fa   : > { %v2491_v38 = vmul.f32 -1.442695, %v1581_v35 }
 0x6fc   : > { %2615 = vmatmul.mubr.msk.f32.vlgmr.msra.gmra.mrb[16].mxu0 %vm1690_vm11, %v2494_v9 }
 0x746   : > { %v2623_v39 = vpop.f32.mrb[12].mxu1 }
 0x747   : > { %v1838_v40 = vpop.f32.mrb[13].mxu1 }
 0x753   : > { %v1918_v44 = vpop.f32.mrb[16].mxu1 }
 0x754   : > { %v2628_v46 = vpop.f32.mrb[17].mxu1 }
 0x755   : > { %v1921_v47 = vpop.f32.mrb[18].mxu1 }
 0x756   : > { %v2629_v48 = vpop.f32.mrb[19].mxu1 }
 0x7cf   : > { %v2616_v49 = vpop.f32.mrb[16].mxu0 }
 0x7d0   : > { %v1763_v50 = vpop.f32.mrb[17].mxu0  ;;  %v1848_v51 = vsel %vm1647_vm13, %v2616_v49, -1e+30 }
 0x7d1   : > { %v1847_v52 = vsel %vm1646_vm12, %v1763_v50, -1e+30  ;;  %v1852_v22 = vsel %vm1690_vm11, %v1848_v51, -inf }
 0x7d2   : > { %1853 = vmax.xlane.f32.xlu0 %v1852_v22  ;;  %v1849_v54 = vsel %vm1690_vm11, %v1847_v52, -inf }
 0x7d3   : > { %1850 = vmax.xlane.f32.xlu1 %v1849_v54 }
 0x85f   : > { %v1854_v55 = vpop.xlane.xlu0 %1853 }
 0x860   : > { %v1856_v56 = vmax.f32 %v1854_v55, %v2623_v39  ;;  %v1851_v57 = vpop.xlane.xlu1 %1850  ;;  %v2492_v39 = vmul.f32 -1.442695, %v1585_v36 }
 0x861   : > { %v1855_v58 = vmax.f32 %v1851_v57, %v1838_v40 }
 0x862   : > { %1864 = vperm.xlu0 %2701, %v1856_v56   ;;  %v1936_v15 = vsub.f32 0.0, %v1856_v56 }
 0x863   : > { %1859 = vperm.xlu1 %2702, %v1855_v58   ;;  %v1935_v11 = vsub.f32 0.0, %v1855_v58 }
 0x864   : > { %v1939_v14 = vmul.f32 1.442695, %v1936_v15  ;;  %v2914_v15 = vld [vmem:[%s3538_s4 + $0x18] sm:$0xff]  }
 0x865   : > { %v1937_v16 = vmul.f32 1.442695, %v1935_v11  ;;  %v675_v11 = vrot.slane %v3349_v33, %v674_v12 }
 0x8e1   : > { %v1865_v59 = vpop.permute.xlu0 %1864 }
 0x8e2   : > { %v1868_v60 = vsub.f32 %v2616_v49, %v1865_v59  ;;  %v1860_v61 = vpop.permute.xlu1 %1859 }
 0x8e3   : > { %v1867_v62 = vsub.f32 %v1763_v50, %v1860_v61 }
 0x8e4   : > { %v1871_v63 = vmul.f32 1.442695, %v1868_v60 }
 0x8e5   : > { %v1869_v1 = vmul.f32 1.442695, %v1867_v62 }
 0x8e6   : > { %2931 = vpow2.f32 %v1871_v63 }
 0x8e7   : > { %2933 = vpow2.f32 %v1869_v1 }
 0x8e8   : > { %2935 = vpow2.f32 %v1939_v14  ;;  %v885_v14 = vadd.f32 %v3356_v37, %v675_v11 }
 0x8e9   : > { %2937 = vpow2.f32 %v1937_v16  ;;  %v888_v16 = vadd.f32 %v3360_v43, %v675_v11  ;;  %v2513_v11 = vld [vmem:[%s3539_s5 + $0x6] ss:$0 sm:$0xff] }
 0x8ea   : > { %2939 = vpow2.f32 %v2491_v38 }
 0x8eb   : > { %2941 = vpow2.f32 %v2492_v39 }
 0x8f0   : > { %v2932_v2 = vpop.eup %2931 }
 0x8f1   : > { %v2934_v3 = vpop.eup %2933  ;;  %v1874_v4 = vsel %vm1647_vm13, %v2932_v2, 0.0 }
 0x8f2   : > { %v1926_v5 = vmul.f32 %v1921_v47, %v1874_v4  ;;  %v1873_v6 = vsel %vm1646_vm12, %v2934_v3, 0.0  ;;  %v2936_v19 = vpop.eup %2935 }
 0x8f3   : > { %v1925_v7 = vmul.f32 %v1918_v44, %v1873_v6  ;;  %v2938_v21 = vpop.eup %2937 }
 0x8f4   : > { %v1930_v8 = vsel %vm1690_vm11, %v1926_v5, 0.0  ;;  %v2940_v40 = vpop.eup %2939 }
 0x8f5   : > { %1931 = vadd.xlane.f32.xlu0 %v1930_v8  ;;  %v1927_v9 = vsel %vm1690_vm11, %v1925_v7, 0.0  ;;  %v1943_v10 = vpack.c.bf16 %v1926_v5, %v1925_v7  ;;  %v2942_v44 = vpop.eup %2941  ;;  %v1638_v46 = vadd.f32 1.0, %v2940_v40  ;;  %v2911_v8 = vld [vmem:[%s3538_s4] sm:$0xff]  }
 0x8f6   : > { %1928 = vadd.xlane.f32.xlu1 %v1927_v9  ;;  %v1639_v47 = vadd.f32 1.0, %v2942_v44  ;;  %v2912_v9 = vld [vmem:[%s3538_s4 + $0x8] sm:$0xff]  }
 0x8f7   : > { %2633 = vmatmul.mubr.msk.bf16.vlgmr.msra.gmra.mrb[20].mxu1 %vm1690_vm11, %v1943_v10  ;;  %2943 = vrcp.f32 %v1638_v46  ;;  %v2913_v10 = vld [vmem:[%s3538_s4 + $0x10] sm:$0xff]  }
 0x8f8   : > { %2644 = vmatprep.mubr.msk.bf16.mxu1 %vm3031_vm0, %v3030_v0  ;;  %2945 = vrcp.f32 %v1639_v47  ;;  %2637 = vmatpush3.bf16.msra.mxu1 %v2911_v8  ;;  %v2915_v47 = vld [vmem:[%s3536_s2 + $0x18] ss:$28 sps:$4 sm:$0xff]  }
 0x8f9   : > { %2638 = vmatprep.subr.bf16.mxu1 %v3030_v0 }
 0x8fc   : > { %2639 = vmatpush3.bf16.msra.mxu1 %v2912_v9 }
 0x8fd   : > { %2640 = vmatprep.subr.bf16.mxu1 %v3030_v0 }
 0x900   : > { %2641 = vmatpush3.bf16.msra.mxu1 %v2913_v10 }
 0x901   : > { %v2944_v48 = vpop.eup %2943  ;;  %2642 = vmatprep.subr.bf16.mxu1 %v3030_v0 }
 0x902   : > { %v2946_v52 = vpop.eup %2945 }
 0x904   : > { %2643 = vmatpush3.bf16.msra.mxu1 %v2914_v15 }
 0x905   : > { %2648 = vmatprep.subr.bf16.mxu1 %v3030_v0 }
 0x982   : > { %v1932_v25 = vpop.xlane.xlu0 %1931 }
 0x983   : > { %v1934_v17 = vand.u32 2147483647, %v1932_v25  ;;  %v1929_v18 = vpop.xlane.xlu1 %1928  ;;  %v2505_v25 = vmul.f32 -1.442695, %v885_v14 }
 0x984   : > { %v1933_v20 = vand.u32 2147483647, %v1929_v18 }
 0x985   : > { %v1942_v23 = vmax.f32 %v1934_v17, %v2936_v19  ;;  %v2506_v17 = vmul.f32 -1.442695, %v888_v16 }
 0x986   : > { %v1941_v24 = vmax.f32 %v1933_v20, %v2938_v21 }
 0x987   : > { %1998 = vperm.xlu0 %2701, %v1942_v23  }
 0x988   : > { %1993 = vperm.xlu1 %2702, %v1941_v24  }
 0x9ca   : > { %v1982_v49 = vpop.f32.mrb[20].mxu1 }
 0x9cb   : > { %v1989_v50 = vmul.f32 %v2944_v48, %v1982_v49  ;;  %v2634_v51 = vpop.f32.mrb[21].mxu1  ;;  %v2916_v49 = vld [vmem:[%s3536_s2 + $0x50] ss:$28 sps:$4 sm:$0xff]  }
 0x9cc   : > { %v1985_v31 = vpop.f32.mrb[22].mxu1  ;;  %v2918_v51 = vld [vmem:[%s3536_s2 + $0xc0] ss:$28 sps:$4 sm:$0xff]  }
 0x9cd   : > { %v1990_v22 = vmul.f32 %v2946_v52, %v1985_v31  ;;  %v2635_v42 = vpop.f32.mrb[23].mxu1  ;;  %v2919_v52 = vld [vmem:[%s3536_s2 + $0xf8] ss:$28 sps:$4 sm:$0xff]   ;;  %v2920_v31 = vld [vmem:[%s3536_s2 + $0x130] ss:$28 sps:$4 sm:$0xff]  }
 0x9ce   : > { %v2922_v42 = vld [vmem:[%s3536_s2 + $0x1a0] ss:$28 sps:$4 sm:$0xff]  }
 0xa06   : > { %v1999_v54 = vpop.permute.xlu0 %1998 }
 0xa07   : > { %2947 = vrcp.f32 %v1999_v54  ;;  %v1994_v53 = vpop.permute.xlu1 %1993  ;;  %v2971_v54 = vld [vmem:[%s3539_s5 + $0x1] sm:$0x3] }
 0xa08   : > { %2949 = vrcp.f32 %v1994_v53  ;;  %v467_v53 = vrot.slane %v2971_v54, %v3352_v34 }
 0xa09   : > { %2951 = vpow2.f32 %v2505_v25 }
 0xa0a   : > { %2953 = vpow2.f32 %v2506_v17 }
 0xa11   : > { %v2948_v55 = vpop.eup %2947 }
 0xa12   : > { %v2950_v56 = vpop.eup %2949  ;;  %v2004_v57 = vmul.f32 %v2948_v55, %v1990_v22  ;;  %v2921_v22 = vld [vmem:[%s3536_s2 + $0x168] ss:$28 sps:$4 sm:$0xff]   ;;  %v587_v55 = vadd.f32 %v3257_v27, %v467_v53 }
 0xa13   : > { %v2002_v58 = vmul.f32 %v2950_v56, %v1989_v50  ;;  %v2952_v18 = vpop.eup %2951  ;;  %v2917_v50 = vld [vmem:[%s3536_s2 + $0x88] ss:$28 sps:$4 sm:$0xff]   ;;  %v591_v56 = vadd.f32 %v3261_v30, %v467_v53 }
 0xa14   : > { %v2008_v59 = vsel %vm1877_vm14, %v2004_v57, 0.0  ;;  %v2954_v19 = vpop.eup %2953  ;;  %v2038_v23 = vadd.f32 1.0, %v2952_v18 }
 0xa15   : > { %2009 = vadd.xlane.f32.xlu0 %v2008_v59  ;;  %v2005_v60 = vsel %vm1877_vm14, %v2002_v58, 0.0  ;;  %v2039_v24 = vadd.f32 1.0, %v2954_v19 }
 0xa16   : > { %2006 = vadd.xlane.f32.xlu1 %v2005_v60 }
 0xaa2   : > { %v2010_v61 = vpop.xlane.xlu0 %2009 }
 0xaa3   : > { %v2013_v62 = vmul.f32 0.015625, %v2010_v61  ;;  %v2007_v63 = vpop.xlane.xlu1 %2006 }
 0xaa4   : > { %v2012_v1 = vmul.f32 0.015625, %v2007_v63 }
 0xaa5   : > { %v2015_v2 = vsub.f32 %v2004_v57, %v2013_v62  ;;  %v2369_v57 = vmul.f32 -1.442695, %v587_v55  ;;  %v2507_v62 = vld [vmem:[%s3539_s5 + $0xd] ss:$0 sm:$0xff] }
 0xaa6   : > { %v2014_v3 = vsub.f32 %v2002_v58, %v2012_v1  ;;  %v2370_v58 = vmul.f32 -1.442695, %v591_v56 }
 0xaa7   : > { %v2017_v6 = vmul.f32 %v2015_v2, %v2015_v2 }
 0xaa8   : > { %v2016_v4 = vmul.f32 %v2014_v3, %v2014_v3 }
 0xaa9   : > { %v2021_v7 = vsel %vm1877_vm14, %v2017_v6, 0.0 }
 0xaaa   : > { %v2018_v5 = vsel %vm1877_vm14, %v2016_v4, 0.0 }
 0xaab   : > { %2019 = vadd.xlane.f32.xlu1 %v2018_v5 }
 0xaaf   : > { %2022 = vadd.xlane.f32.xlu1 %v2021_v7 }
 0xb38   : > { %v2020_v20 = vpop.xlane.xlu1 %2019 }
 0xb39   : > { %v2024_v21 = vmul.f32 0.015625, %v2020_v20 }
 0xb3b   : > { %v2026_v28 = vadd.f32 1e-05, %v2024_v21 }
 0xb3c   : > { %v2023_v32 = vpop.xlane.xlu1 %2022 }
 0xb3d   : > { %2955 = vrsqrt.f32 %v2026_v28  ;;  %v2025_v13 = vmul.f32 0.015625, %v2023_v32 }
 0xb3e   : > { %2957 = vrcp.f32 %v2038_v23 }
 0xb3f   : > { %2959 = vrcp.f32 %v2039_v24  ;;  %v2027_v33 = vadd.f32 1e-05, %v2025_v13 }
 0xb41   : > { %2961 = vrsqrt.f32 %v2027_v33 }
 0xb42   : > { %2963 = vpow2.f32 %v2369_v57 }
 0xb43   : > { %2965 = vpow2.f32 %v2370_v58 }
 0xb47   : > { %v2956_v37 = vpop.eup %2955 }
 0xb48   : > { %v2958_v43 = vpop.eup %2957  ;;  %v2030_v35 = vmul.f32 %v2956_v37, %v2014_v3 }
 0xb49   : > { %v2960_v12 = vpop.eup %2959  ;;  %v2044_v38 = vmul.f32 %v2958_v43, %v885_v14 }
 0xb4a   : > { %v2045_v39 = vmul.f32 %v2960_v12, %v888_v16 }
 0xb4b   : > { %v2962_v36 = vpop.eup %2961  ;;  %v2046_v46 = vmul.f32 %v2044_v38, %v2030_v35 }
 0xb4c   : > { %v2031_v40 = vmul.f32 %v2962_v36, %v2015_v2 }
 0xb4e   : > { %v2047_v44 = vmul.f32 %v2045_v39, %v2031_v40 }
 0xb50   : > { %v2048_v48 = vpack.c.bf16 %v2047_v44, %v2046_v46 }
 0xb52   : > { %2645 = vmatmul.mubr.msk.bf16.vlgmr.msra.gmra.mrb[24].mxu1 %vm1877_vm14, %v2048_v48 }
 0xb53   : > { %2649 = vmatpush3.bf16.msra.mxu1 %v2915_v47  ;;  %2664 = vmatprep.mubr.msk.bf16.mxu1 %vm3031_vm0, %v3030_v0 }
 0xb54   : > { %2650 = vmatprep.subr.bf16.mxu1 %v3030_v0 }
 0xb57   : > { %2651 = vmatpush3.bf16.msra.mxu1 %v2916_v49 }
 0xb58   : > { %2652 = vmatprep.subr.bf16.mxu1 %v3030_v0 }
 0xb5b   : > { %2653 = vmatpush3.bf16.msra.mxu1 %v2917_v50 }
 0xb5c   : > { %2654 = vmatprep.subr.bf16.mxu1 %v3030_v0 }
 0xb5f   : > { %2655 = vmatpush3.bf16.msra.mxu1 %v2918_v51 }
 0xb60   : > { %2656 = vmatprep.subr.bf16.mxu1 %v3030_v0 }
 0xb63   : > { %2657 = vmatpush3.bf16.msra.mxu1 %v2919_v52 }
 0xb64   : > { %2658 = vmatprep.subr.bf16.mxu1 %v3030_v0 }
 0xb67   : > { %2659 = vmatpush3.bf16.msra.mxu1 %v2920_v31 }
 0xb68   : > { %2660 = vmatprep.subr.bf16.mxu1 %v3030_v0 }
 0xb6b   : > { %2661 = vmatpush3.bf16.msra.mxu1 %v2921_v22 }
 0xb6c   : > { %2662 = vmatprep.subr.bf16.mxu1 %v3030_v0  ;;  %v2964_v0 = vpop.eup %2963 }
 0xb6d   : > { %v2966_v59 = vpop.eup %2965  ;;  %v599_v60 = vadd.f32 1.0, %v2964_v0 }
 0xb6e   : > { %v600_v61 = vadd.f32 1.0, %v2966_v59 }
 0xb6f   : > { %2663 = vmatpush3.bf16.msra.mxu1 %v2922_v42  ;;  %2967 = vrcp.f32 %v599_v60 }
 0xb70   : > { %2969 = vrcp.f32 %v600_v61 }
 0xb79   : > { %v2968_v63 = vpop.eup %2967 }
 0xb7a   : > { %v2970_v2 = vpop.eup %2969  ;;  %v605_v3 = vmul.f32 %v2968_v63, %v587_v55 }
 0xb7b   : > { %v606_v7 = vmul.f32 %v2970_v2, %v591_v56 }
 0xc25   : > { %v2125_v34 = vpop.f32.mrb[24].mxu1 }
 0xc26   : > { %v2126_v1 = vadd.f32 %v2507_v62, %v2125_v34  ;;  %v2646_v27 = vpop.f32.mrb[25].mxu1 }
 0xc27   : > { %v2128_v30 = vpop.f32.mrb[26].mxu1 }
 0xc28   : > { %v2132_v4 = vadd.f32 %v2126_v1, %v3255_v26  ;;  %v2129_v5 = vadd.f32 %v2507_v62, %v2128_v30  ;;  %v2647_v6 = vpop.f32.mrb[27].mxu1 }
 0xc2a   : > { %v2134_v8 = vmul.f32 %v2132_v4, %v605_v3  ;;  %v2133_v9 = vadd.f32 %v2129_v5, %v3259_v29 }
 0xc2c   : > { %v2135_v10 = vmul.f32 %v2133_v9, %v606_v7 }
 0xc2e   : > { %v2136_v15 = vpack.c.bf16 %v2135_v10, %v2134_v8 }
 0xc30   : > { %2665 = vmatmul.mubr.bf16.vlgmr.msra.gmra.mrb[28].mxu1 %v2136_v15 }
 0xd03   : > { %v2242_v14 = vpop.f32.mrb[28].mxu1 }
 0xd04   : > { %v2243_v16 = vadd.f32 %v2513_v11, %v2242_v14  ;;  %v2666_v25 = vpop.f32.mrb[29].mxu1 }
 0xd05   : > { %v2245_v26 = vpop.f32.mrb[30].mxu1 }
 0xd06   : > { %v2249_v17 = vadd.f32 %v2243_v16, %v3189_v41  ;;  %v2246_v18 = vadd.f32 %v2513_v11, %v2245_v26  ;;  %v2667_v29 = vpop.f32.mrb[31].mxu1 }
 0xd08   : > { %2251 = vst [vmem:[%s246_s7] sm:$0xff] %v2249_v17  ;;  %v2250_v19 = vadd.f32 %v2246_v18, %v3192_v45 }
 0xd0a   : > { %2252 = vst [vmem:[%s246_s7 + $0x8] sm:$0xff] %v2250_v19 }
 0xd0b PF: > { %s23_s26 = sadd.s32 1, %s3024_s26  }
 0xd0c   : > { %p20_p8 = scmp.ge.s32.totalorder %s23_s26, 4  }
 0xd0e   :  { %22 = sbr.rel (!%p20_p8) target bundleno = 16 (0x10), region = 75 }
 0xd15   :  { %2274 = vsyncpa [#allocation5], 1 }
 0xd16   :  { %2276 = vsyncpa [#allocation5 + $0x1], 1 }

</bundles_post_ra>
